<compile_context>
chip_gen: v7x
topology: tpu7x:2x2x1
jax: 0.10.0
libtpu: 0.0.40
codegen_flags: <defaults>
</compile_context>

<pallas_src>
import numpy as np
import jax
import jax.numpy as jnp
from jax.experimental import pallas as pl
from jax.experimental.pallas import tpu as pltpu


# ----------------------------------------------------------------------------
# Wrapper + Pallas kernel
# ----------------------------------------------------------------------------
def up_forward_pallas(x, x_short, p):
    """x: (B, Cs, Hs, Ws) NCHW, x_short: (B, Cs, H, W) NCHW -> (B, Cout, H, W)."""
    B, Cs, Hs, Ws = x.shape
    _, _, H, W = x_short.shape
    Cmid = p['m1'].shape[-1] // W
    Cout = p['m3'].shape[-1] // W
    pad_w = max((W + 2) * 2 * Cs, (W + 2) * Cmid)   # widest padded activation

    # NCHW -> lane-dense (B, H, W*C): channels fastest within each row.
    x_ld = jnp.transpose(x, (0, 2, 3, 1)).reshape(B, Hs, Ws * Cs)
    xs_ld = jnp.transpose(x_short, (0, 2, 3, 1)).reshape(B, H, W * Cs)

    def softplus(v):
        # matches torch.nn.functional.softplus (threshold=20)
        return jnp.where(v > 20.0, v, jnp.log1p(jnp.exp(jnp.minimum(v, 20.0))))

    def mish(v):
        return v * jnp.tanh(softplus(v))

    def kernel(x_ref, xs_ref, uh_ref, mw_ref,
               ms_ref, bs_ref, m1_ref, b1_ref, m2_ref, b2_ref, m3_ref, b3_ref,
               o_ref, pad_ref):
        # pad_ref: (H+2, pad_w) zero-padded lane-dense scratch reused by all
        # four convs (re-zeroed each time so the halo columns/rows stay 0).

        def load_padded(acts):
            # acts: list of (lane-dense activation (H, W*c), channel count c);
            # each goes into its own contiguous column segment of the scratch.
            pad_ref[...] = jnp.zeros_like(pad_ref)
            base = 0
            for act, c in acts:
                pad_ref[1:H + 1, base + c:base + (W + 1) * c] = act
                base += (W + 2) * c

        def band_conv(m_ref, b_ref):
            # 3x3 "same" conv == 3 matmuls against banded weight matrices.
            kw = m_ref.shape[1]
            acc = jnp.dot(pad_ref[0:H, 0:kw], m_ref[0],
                          preferred_element_type=jnp.float32)
            acc = acc + jnp.dot(pad_ref[1:H + 1, 0:kw], m_ref[1],
                                preferred_element_type=jnp.float32)
            acc = acc + jnp.dot(pad_ref[2:H + 2, 0:kw], m_ref[2],
                                preferred_element_type=jnp.float32)
            return acc + b_ref[...]                      # (H, W*Cout)

        # conv_short on the skip connection (no BN / activation)
        load_padded([(xs_ref[...], Cs)])
        cs = band_conv(ms_ref, bs_ref)                   # (H, W*Cs)

        # bilinear x2 upsample: two matmuls, no transposes
        t = jnp.dot(uh_ref[...], x_ref[...],
                    preferred_element_type=jnp.float32)  # (H, Ws*Cs)
        xu = jnp.dot(t, mw_ref[...],
                     preferred_element_type=jnp.float32)  # (H, W*Cs)

        # channel concat == two segment writes; Block conv1 + Mish
        load_padded([(cs, Cs), (xu, Cs)])
        h = mish(band_conv(m1_ref, b1_ref))              # (H, W*Cmid)

        load_padded([(h, Cmid)])
        h = mish(band_conv(m2_ref, b2_ref))              # (H, W*Cmid)

        load_padded([(h, Cmid)])
        o_ref[...] = mish(band_conv(m3_ref, b3_ref)).astype(o_ref.dtype)

    def const_spec(a):
        nd = a.ndim
        return pl.BlockSpec(a.shape, lambda b, _n=nd: (0,) * _n)

    in_specs = [
        pl.BlockSpec((None, Hs, Ws * Cs), lambda b: (b, 0, 0)),
        pl.BlockSpec((None, H, W * Cs), lambda b: (b, 0, 0)),
        const_spec(p['uh']), const_spec(p['mw']),
        const_spec(p['ms']), const_spec(p['bs']),
        const_spec(p['m1']), const_spec(p['b1']),
        const_spec(p['m2']), const_spec(p['b2']),
        const_spec(p['m3']), const_spec(p['b3']),
    ]

    out_ld = pl.pallas_call(
        kernel,
        grid=(B,),
        in_specs=in_specs,
        out_specs=pl.BlockSpec((None, H, W * Cout), lambda b: (b, 0, 0)),
        out_shape=jax.ShapeDtypeStruct((B, H, W * Cout), jnp.float32),
        scratch_shapes=[pltpu.VMEM((H + 2, pad_w), jnp.float32)],
        compiler_params=pltpu.CompilerParams(
            dimension_semantics=("parallel",)),
    )(x_ld, xs_ld, p['uh'], p['mw'], p['ms'], p['bs'],
      p['m1'], p['b1'], p['m2'], p['b2'], p['m3'], p['b3'])

    # (B, H, W*Cout) lane-dense -> (B, Cout, H, W) NCHW
    return jnp.transpose(out_ld.reshape(B, H, W, Cout), (0, 3, 1, 2))


# ----------------------------------------------------------------------------
# Parameter construction (deterministic, synthetic) + BN folding + band matrices
# ----------------------------------------------------------------------------
def bilinear_up2_matrix(n):
    """PyTorch Upsample(scale=2, bilinear, align_corners=False) as a (2n, n) matrix."""
    m = np.zeros((2 * n, n), np.float32)
    for i in range(2 * n):
        src = max((i + 0.5) * 0.5 - 0.5, 0.0)
        i0 = int(np.floor(src))
        i1 = min(i0 + 1, n - 1)
        f = src - i0
        m[i, i0] += 1.0 - f
        m[i, i1] += f
    return jnp.asarray(m)


def fold_bn(w, b, gamma, beta, mean, var, eps=1e-5):
    s = gamma / jnp.sqrt(var + eps)
    return w * s[:, None, None, None], (b - mean) * s + beta


def conv_band_matrices(w, W):
    """Conv weight (Cout, Cin, 3, 3) -> (3, (W+2)*Cin, W*Cout) banded matrices
    so a 3x3 'same' conv on a lane-dense (H, W*Cin) activation becomes three
    matmuls (one per kernel row dy) on its zero-padded (H+2, (W+2)*Cin) form."""
    cout, cin = w.shape[0], w.shape[1]
    wt = jnp.transpose(w, (2, 3, 1, 0))              # (dy, dx, ci, co)
    eye = jnp.eye(W, dtype=w.dtype)
    mats = []
    for dy in range(3):
        m = jnp.zeros(((W + 2) * cin, W * cout), w.dtype)
        for dx in range(3):
            shift = jnp.pad(eye, ((dx, 2 - dx), (0, 0)))   # (W+2, W): [w+dx, w]=1
            m = m + jnp.kron(shift, wt[dy, dx])
        mats.append(m)
    return jnp.stack(mats)


def tile_bias(b, W):
    """(Cout,) -> (1, W*Cout) bias in the channel-interleaved lane-dense layout."""
    return jnp.tile(b, W).reshape(1, -1)


def build_params(key, in_channels, out_channels, Hs, Ws):
    cs = in_channels // 2
    cmid = in_channels // 2
    H, W = 2 * Hs, 2 * Ws
    ks = list(jax.random.split(key, 8))

    def conv_init(k, cout, cin):
        kw, kb = jax.random.split(k)
        w = jax.random.normal(kw, (cout, cin, 3, 3), jnp.float32) * 0.1
        b = jax.random.normal(kb, (cout,), jnp.float32) * 0.05
        return w, b

    def bn_init(k, c):
        k1, k2, k3, k4 = jax.random.split(k, 4)
        gamma = 1.0 + 0.2 * jax.random.normal(k1, (c,), jnp.float32)
        beta = 0.1 * jax.random.normal(k2, (c,), jnp.float32)
        mean = 0.1 * jax.random.normal(k3, (c,), jnp.float32)
        var = 0.5 + jax.random.uniform(k4, (c,), jnp.float32)
        return gamma, beta, mean, var

    ws, bs = conv_init(ks[0], cs, cs)                    # conv_short (no BN)
    w1, b1 = conv_init(ks[1], cmid, in_channels)
    w2, b2 = conv_init(ks[2], cmid, cmid)
    w3, b3 = conv_init(ks[3], out_channels, cmid)
    bn1 = bn_init(ks[4], cmid)
    bn2 = bn_init(ks[5], cmid)
    bn3 = bn_init(ks[6], out_channels)

    w1f, b1f = fold_bn(w1, b1, *bn1)
    w2f, b2f = fold_bn(w2, b2, *bn2)
    w3f, b3f = fold_bn(w3, b3, *bn3)

    uh = bilinear_up2_matrix(Hs)                          # (H, Hs)
    uw = bilinear_up2_matrix(Ws)                          # (W, Ws)
    # Upsample-along-W matrix for the channel-interleaved lane-dense layout.
    mw = jnp.einsum('Ww,cd->wcWd', uw, jnp.eye(cs, dtype=jnp.float32))
    mw = mw.reshape(Ws * cs, W * cs)

    # conv1 consumes the concat [conv_short(x_short), up(x)] laid out as two
    # column segments of the padded scratch; build its band matrix to match.
    m1 = jnp.concatenate(
        [conv_band_matrices(w1f[:, :cs], W),
         conv_band_matrices(w1f[:, cs:], W)], axis=1)

    kernel_params = {
        'uh': uh, 'mw': mw,
        'ms': conv_band_matrices(ws, W), 'bs': tile_bias(bs, W),
        'm1': m1, 'b1': tile_bias(b1f, W),
        'm2': conv_band_matrices(w2f, W), 'b2': tile_bias(b2f, W),
        'm3': conv_band_matrices(w3f, W), 'b3': tile_bias(b3f, W),
    }
    ref_params = {
        'uh': uh, 'uw': uw,
        'ws': ws, 'bs': bs, 'w1': w1f, 'b1': b1f,
        'w2': w2f, 'b2': b2f, 'w3': w3f, 'b3': b3f,
    }
    return kernel_params, ref_params


# ----------------------------------------------------------------------------
# Pure-JAX reference (same math, lax.conv based) for validation
# ----------------------------------------------------------------------------
def ref_forward(x, x_short, p):
    def conv(v, w, b):
        y = jax.lax.conv_general_dilated(
            v, w, (1, 1), ((1, 1), (1, 1)),
            dimension_numbers=('NCHW', 'OIHW', 'NCHW'),
            precision=jax.lax.Precision.HIGHEST)
        return y + b[None, :, None, None]

    def mish(v):
        sp = jnp.where(v > 20.0, v, jnp.log1p(jnp.exp(jnp.minimum(v, 20.0))))
        return v * jnp.tanh(sp)

    cs = conv(x_short, p['ws'], p['bs'])
    xu = jnp.einsum('Hh,bchw->bcHw', p['uh'], x,
                    precision=jax.lax.Precision.HIGHEST)
    xu = jnp.einsum('Ww,bchw->bchW', p['uw'], xu,
                    precision=jax.lax.Precision.HIGHEST)
    xc = jnp.concatenate([cs, xu], axis=1)
    h = mish(conv(xc, p['w1'], p['b1']))
    h = mish(conv(h, p['w2'], p['b2']))
    h = mish(conv(h, p['w3'], p['b3']))
    return h


# ----------------------------------------------------------------------------
if __name__ == "__main__":
    B = 2
    in_channels = 8          # Up(in_channels=8, out_channels=8)
    out_channels = 8
    Cs = in_channels // 2    # channels of x and x_short
    H = W = 16               # x_short spatial size
    Hs = Ws = H // 2         # x spatial size (upsampled x2 inside)

    key = jax.random.PRNGKey(0)
    k_x, k_xs, k_p = jax.random.split(key, 3)
    x = jax.random.normal(k_x, (B, Cs, Hs, Ws), jnp.float32)
    x_short = jax.random.normal(k_xs, (B, Cs, H, W), jnp.float32)

    kernel_params, ref_params = build_params(k_p, in_channels, out_channels, Hs, Ws)

    out = up_forward_pallas(x, x_short, kernel_params)
    out = jax.block_until_ready(out)

    ref = ref_forward(x, x_short, ref_params)
    if not bool(jnp.allclose(out, ref, rtol=5e-3, atol=5e-3)):
        raise AssertionError(
            f"mismatch: max abs diff = {float(jnp.max(jnp.abs(out - ref)))}")

    print("KERNEL_OK")
</pallas_src>

<mosaic_0001>
module attributes {stable_mosaic.version = 11 : i64} {
  func.func @kernel(%arg0: i32, %arg1: memref<1x8x32xf32, #tpu.memory_space<vmem>>, %arg2: memref<1x16x64xf32, #tpu.memory_space<vmem>>, %arg3: memref<16x8xf32, #tpu.memory_space<vmem>>, %arg4: memref<32x64xf32, #tpu.memory_space<vmem>>, %arg5: memref<3x72x64xf32, #tpu.memory_space<vmem>>, %arg6: memref<1x64xf32, #tpu.memory_space<vmem>>, %arg7: memref<3x144x64xf32, #tpu.memory_space<vmem>>, %arg8: memref<1x64xf32, #tpu.memory_space<vmem>>, %arg9: memref<3x72x64xf32, #tpu.memory_space<vmem>>, %arg10: memref<1x64xf32, #tpu.memory_space<vmem>>, %arg11: memref<3x72x128xf32, #tpu.memory_space<vmem>>, %arg12: memref<1x128xf32, #tpu.memory_space<vmem>>, %arg13: memref<1x16x128xf32, #tpu.memory_space<vmem>>, %arg14: memref<18x144xf32, #tpu.memory_space<vmem>>) attributes {dimension_semantics = [#tpu.dimension_semantics<parallel>], iteration_bounds = array<i64: 2>, scalar_prefetch = 0 : i64, scratch_operands = 1 : i64, tpu.core_type = #tpu.core_type<tc>, window_params = [{transform_indices = @transform_0, window_bounds = array<i64: 1, 8, 32>}, {transform_indices = @transform_1, window_bounds = array<i64: 1, 16, 64>}, {pipeline_mode = #tpu.pipeline_mode<synchronous>, transform_indices = @transform_2, window_bounds = array<i64: 16, 8>}, {pipeline_mode = #tpu.pipeline_mode<synchronous>, transform_indices = @transform_3, window_bounds = array<i64: 32, 64>}, {pipeline_mode = #tpu.pipeline_mode<synchronous>, transform_indices = @transform_4, window_bounds = array<i64: 3, 72, 64>}, {pipeline_mode = #tpu.pipeline_mode<synchronous>, transform_indices = @transform_5, window_bounds = array<i64: 1, 64>}, {pipeline_mode = #tpu.pipeline_mode<synchronous>, transform_indices = @transform_6, window_bounds = array<i64: 3, 144, 64>}, {pipeline_mode = #tpu.pipeline_mode<synchronous>, transform_indices = @transform_7, window_bounds = array<i64: 1, 64>}, {pipeline_mode = #tpu.pipeline_mode<synchronous>, transform_indices = @transform_8, window_bounds = array<i64: 3, 72, 64>}, {pipeline_mode = #tpu.pipeline_mode<synchronous>, transform_indices = @transform_9, window_bounds = array<i64: 1, 64>}, {pipeline_mode = #tpu.pipeline_mode<synchronous>, transform_indices = @transform_10, window_bounds = array<i64: 3, 72, 128>}, {pipeline_mode = #tpu.pipeline_mode<synchronous>, transform_indices = @transform_11, window_bounds = array<i64: 1, 128>}, {transform_indices = @transform_12, window_bounds = array<i64: 1, 16, 128>}]} {
    %c0 = arith.constant 0 : index
    %c0_0 = arith.constant 0 : index
    %c0_1 = arith.constant 0 : index
    %0 = vector.load %arg2[%c0, %c0_0, %c0_1] : memref<1x16x64xf32, #tpu.memory_space<vmem>>, vector<1x16x64xf32>
    %1 = vector.shape_cast %0 : vector<1x16x64xf32> to vector<16x64xf32>
    %cst = arith.constant 0.000000e+00 : f32
    %2 = vector.broadcast %cst : f32 to vector<18x144xf32>
    %c0_2 = arith.constant 0 : index
    %c0_3 = arith.constant 0 : index
    %3 = vector.load %arg14[%c0_2, %c0_3] : memref<18x144xf32, #tpu.memory_space<vmem>>, vector<18x144xf32>
    tpu.vector_store %arg14[%c0_2, %c0_3], %2 {strides = array<i32>} : memref<18x144xf32, #tpu.memory_space<vmem>>, vector<18x144xf32>,
    %c1 = arith.constant 1 : index
    %c4 = arith.constant 4 : index
    %4 = vector.load %arg14[%c1, %c4] : memref<18x144xf32, #tpu.memory_space<vmem>>, vector<16x64xf32>
    tpu.vector_store %arg14[%c1, %c4], %1 {strides = array<i32>} : memref<18x144xf32, #tpu.memory_space<vmem>>, vector<16x64xf32>,
    %c0_4 = arith.constant 0 : index
    %c0_5 = arith.constant 0 : index
    %5 = vector.load %arg14[%c0_4, %c0_5] : memref<18x144xf32, #tpu.memory_space<vmem>>, vector<16x72xf32>
    %c0_6 = arith.constant 0 : index
    %c0_7 = arith.constant 0 : index
    %c0_8 = arith.constant 0 : index
    %6 = vector.load %arg5[%c0_6, %c0_7, %c0_8] : memref<3x72x64xf32, #tpu.memory_space<vmem>>, vector<1x72x64xf32>
    %7 = vector.shape_cast %6 : vector<1x72x64xf32> to vector<72x64xf32>
    %cst_9 = arith.constant dense<0.000000e+00> : vector<16x64xf32>
    %8 = tpu.matmul %5, %7, %cst_9 {dimension_numbers = #tpu.dot_dimension_numbers<[1], [0], [0], [1], [0, 0, 1, 1], [], []>} : vector<16x72xf32>, vector<72x64xf32>, vector<16x64xf32> -> vector<16x64xf32>
    %c1_10 = arith.constant 1 : index
    %c0_11 = arith.constant 0 : index
    %9 = vector.load %arg14[%c1_10, %c0_11] : memref<18x144xf32, #tpu.memory_space<vmem>>, vector<16x72xf32>
    %c1_12 = arith.constant 1 : index
    %c0_13 = arith.constant 0 : index
    %c0_14 = arith.constant 0 : index
    %10 = vector.load %arg5[%c1_12, %c0_13, %c0_14] : memref<3x72x64xf32, #tpu.memory_space<vmem>>, vector<1x72x64xf32>
    %11 = vector.shape_cast %10 : vector<1x72x64xf32> to vector<72x64xf32>
    %cst_15 = arith.constant dense<0.000000e+00> : vector<16x64xf32>
    %12 = tpu.matmul %9, %11, %cst_15 {dimension_numbers = #tpu.dot_dimension_numbers<[1], [0], [0], [1], [0, 0, 1, 1], [], []>} : vector<16x72xf32>, vector<72x64xf32>, vector<16x64xf32> -> vector<16x64xf32>
    %13 = arith.addf %8, %12 : vector<16x64xf32>
    %c2 = arith.constant 2 : index
    %c0_16 = arith.constant 0 : index
    %14 = vector.load %arg14[%c2, %c0_16] : memref<18x144xf32, #tpu.memory_space<vmem>>, vector<16x72xf32>
    %c2_17 = arith.constant 2 : index
    %c0_18 = arith.constant 0 : index
    %c0_19 = arith.constant 0 : index
    %15 = vector.load %arg5[%c2_17, %c0_18, %c0_19] : memref<3x72x64xf32, #tpu.memory_space<vmem>>, vector<1x72x64xf32>
    %16 = vector.shape_cast %15 : vector<1x72x64xf32> to vector<72x64xf32>
    %cst_20 = arith.constant dense<0.000000e+00> : vector<16x64xf32>
    %17 = tpu.matmul %14, %16, %cst_20 {dimension_numbers = #tpu.dot_dimension_numbers<[1], [0], [0], [1], [0, 0, 1, 1], [], []>} : vector<16x72xf32>, vector<72x64xf32>, vector<16x64xf32> -> vector<16x64xf32>
    %18 = arith.addf %13, %17 : vector<16x64xf32>
    %c0_21 = arith.constant 0 : index
    %c0_22 = arith.constant 0 : index
    %19 = vector.load %arg6[%c0_21, %c0_22] : memref<1x64xf32, #tpu.memory_space<vmem>>, vector<1x64xf32>
    %20 = vector.broadcast %19 : vector<1x64xf32> to vector<16x64xf32>
    %21 = arith.addf %18, %20 : vector<16x64xf32>
    %c0_23 = arith.constant 0 : index
    %c0_24 = arith.constant 0 : index
    %22 = vector.load %arg3[%c0_23, %c0_24] : memref<16x8xf32, #tpu.memory_space<vmem>>, vector<16x8xf32>
    %c0_25 = arith.constant 0 : index
    %c0_26 = arith.constant 0 : index
    %c0_27 = arith.constant 0 : index
    %23 = vector.load %arg1[%c0_25, %c0_26, %c0_27] : memref<1x8x32xf32, #tpu.memory_space<vmem>>, vector<1x8x32xf32>
    %24 = vector.shape_cast %23 : vector<1x8x32xf32> to vector<8x32xf32>
    %cst_28 = arith.constant dense<0.000000e+00> : vector<16x32xf32>
    %25 = tpu.matmul %22, %24, %cst_28 {dimension_numbers = #tpu.dot_dimension_numbers<[1], [0], [0], [1], [0, 0, 1, 1], [], []>} : vector<16x8xf32>, vector<8x32xf32>, vector<16x32xf32> -> vector<16x32xf32>
    %c0_29 = arith.constant 0 : index
    %c0_30 = arith.constant 0 : index
    %26 = vector.load %arg4[%c0_29, %c0_30] : memref<32x64xf32, #tpu.memory_space<vmem>>, vector<32x64xf32>
    %cst_31 = arith.constant dense<0.000000e+00> : vector<16x64xf32>
    %27 = tpu.matmul %25, %26, %cst_31 {dimension_numbers = #tpu.dot_dimension_numbers<[1], [0], [0], [1], [0, 0, 1, 1], [], []>} : vector<16x32xf32>, vector<32x64xf32>, vector<16x64xf32> -> vector<16x64xf32>
    %cst_32 = arith.constant 0.000000e+00 : f32
    %28 = vector.broadcast %cst_32 : f32 to vector<18x144xf32>
    %c0_33 = arith.constant 0 : index
    %c0_34 = arith.constant 0 : index
    %29 = vector.load %arg14[%c0_33, %c0_34] : memref<18x144xf32, #tpu.memory_space<vmem>>, vector<18x144xf32>
    tpu.vector_store %arg14[%c0_33, %c0_34], %28 {strides = array<i32>} : memref<18x144xf32, #tpu.memory_space<vmem>>, vector<18x144xf32>,
    %c1_35 = arith.constant 1 : index
    %c4_36 = arith.constant 4 : index
    %30 = vector.load %arg14[%c1_35, %c4_36] : memref<18x144xf32, #tpu.memory_space<vmem>>, vector<16x64xf32>
    tpu.vector_store %arg14[%c1_35, %c4_36], %21 {strides = array<i32>} : memref<18x144xf32, #tpu.memory_space<vmem>>, vector<16x64xf32>,
    %c1_37 = arith.constant 1 : index
    %c76 = arith.constant 76 : index
    %31 = vector.load %arg14[%c1_37, %c76] : memref<18x144xf32, #tpu.memory_space<vmem>>, vector<16x64xf32>
    tpu.vector_store %arg14[%c1_37, %c76], %27 {strides = array<i32>} : memref<18x144xf32, #tpu.memory_space<vmem>>, vector<16x64xf32>,
    %c0_38 = arith.constant 0 : index
    %c0_39 = arith.constant 0 : index
    %32 = vector.load %arg14[%c0_38, %c0_39] : memref<18x144xf32, #tpu.memory_space<vmem>>, vector<16x144xf32>
    %c0_40 = arith.constant 0 : index
    %c0_41 = arith.constant 0 : index
    %c0_42 = arith.constant 0 : index
    %33 = vector.load %arg7[%c0_40, %c0_41, %c0_42] : memref<3x144x64xf32, #tpu.memory_space<vmem>>, vector<1x144x64xf32>
    %34 = vector.shape_cast %33 : vector<1x144x64xf32> to vector<144x64xf32>
    %cst_43 = arith.constant dense<0.000000e+00> : vector<16x64xf32>
    %35 = tpu.matmul %32, %34, %cst_43 {dimension_numbers = #tpu.dot_dimension_numbers<[1], [0], [0], [1], [0, 0, 1, 1], [], []>} : vector<16x144xf32>, vector<144x64xf32>, vector<16x64xf32> -> vector<16x64xf32>
    %c1_44 = arith.constant 1 : index
    %c0_45 = arith.constant 0 : index
    %36 = vector.load %arg14[%c1_44, %c0_45] : memref<18x144xf32, #tpu.memory_space<vmem>>, vector<16x144xf32>
    %c1_46 = arith.constant 1 : index
    %c0_47 = arith.constant 0 : index
    %c0_48 = arith.constant 0 : index
    %37 = vector.load %arg7[%c1_46, %c0_47, %c0_48] : memref<3x144x64xf32, #tpu.memory_space<vmem>>, vector<1x144x64xf32>
    %38 = vector.shape_cast %37 : vector<1x144x64xf32> to vector<144x64xf32>
    %cst_49 = arith.constant dense<0.000000e+00> : vector<16x64xf32>
    %39 = tpu.matmul %36, %38, %cst_49 {dimension_numbers = #tpu.dot_dimension_numbers<[1], [0], [0], [1], [0, 0, 1, 1], [], []>} : vector<16x144xf32>, vector<144x64xf32>, vector<16x64xf32> -> vector<16x64xf32>
    %40 = arith.addf %35, %39 : vector<16x64xf32>
    %c2_50 = arith.constant 2 : index
    %c0_51 = arith.constant 0 : index
    %41 = vector.load %arg14[%c2_50, %c0_51] : memref<18x144xf32, #tpu.memory_space<vmem>>, vector<16x144xf32>
    %c2_52 = arith.constant 2 : index
    %c0_53 = arith.constant 0 : index
    %c0_54 = arith.constant 0 : index
    %42 = vector.load %arg7[%c2_52, %c0_53, %c0_54] : memref<3x144x64xf32, #tpu.memory_space<vmem>>, vector<1x144x64xf32>
    %43 = vector.shape_cast %42 : vector<1x144x64xf32> to vector<144x64xf32>
    %cst_55 = arith.constant dense<0.000000e+00> : vector<16x64xf32>
    %44 = tpu.matmul %41, %43, %cst_55 {dimension_numbers = #tpu.dot_dimension_numbers<[1], [0], [0], [1], [0, 0, 1, 1], [], []>} : vector<16x144xf32>, vector<144x64xf32>, vector<16x64xf32> -> vector<16x64xf32>
    %45 = arith.addf %40, %44 : vector<16x64xf32>
    %c0_56 = arith.constant 0 : index
    %c0_57 = arith.constant 0 : index
    %46 = vector.load %arg8[%c0_56, %c0_57] : memref<1x64xf32, #tpu.memory_space<vmem>>, vector<1x64xf32>
    %47 = vector.broadcast %46 : vector<1x64xf32> to vector<16x64xf32>
    %48 = arith.addf %45, %47 : vector<16x64xf32>
    %cst_58 = arith.constant 2.000000e+01 : f32
    %49 = vector.broadcast %cst_58 : f32 to vector<16x64xf32>
    %50 = arith.cmpf ogt, %48, %49 : vector<16x64xf32>
    %cst_59 = arith.constant 2.000000e+01 : f32
    %51 = vector.broadcast %cst_59 : f32 to vector<16x64xf32>
    %52 = arith.minimumf %48, %51 : vector<16x64xf32>
    %53 = math.exp %52 : vector<16x64xf32>
    %54 = math.log1p %53 : vector<16x64xf32>
    %55 = arith.select %50, %48, %54 : vector<16x64xi1>, vector<16x64xf32>
    %56 = math.tanh %55 : vector<16x64xf32>
    %57 = arith.mulf %48, %56 : vector<16x64xf32>
    %cst_60 = arith.constant 0.000000e+00 : f32
    %58 = vector.broadcast %cst_60 : f32 to vector<18x144xf32>
    %c0_61 = arith.constant 0 : index
    %c0_62 = arith.constant 0 : index
    %59 = vector.load %arg14[%c0_61, %c0_62] : memref<18x144xf32, #tpu.memory_space<vmem>>, vector<18x144xf32>
    tpu.vector_store %arg14[%c0_61, %c0_62], %58 {strides = array<i32>} : memref<18x144xf32, #tpu.memory_space<vmem>>, vector<18x144xf32>,
    %c1_63 = arith.constant 1 : index
    %c4_64 = arith.constant 4 : index
    %60 = vector.load %arg14[%c1_63, %c4_64] : memref<18x144xf32, #tpu.memory_space<vmem>>, vector<16x64xf32>
    tpu.vector_store %arg14[%c1_63, %c4_64], %57 {strides = array<i32>} : memref<18x144xf32, #tpu.memory_space<vmem>>, vector<16x64xf32>,
    %c0_65 = arith.constant 0 : index
    %c0_66 = arith.constant 0 : index
    %61 = vector.load %arg14[%c0_65, %c0_66] : memref<18x144xf32, #tpu.memory_space<vmem>>, vector<16x72xf32>
    %c0_67 = arith.constant 0 : index
    %c0_68 = arith.constant 0 : index
    %c0_69 = arith.constant 0 : index
    %62 = vector.load %arg9[%c0_67, %c0_68, %c0_69] : memref<3x72x64xf32, #tpu.memory_space<vmem>>, vector<1x72x64xf32>
    %63 = vector.shape_cast %62 : vector<1x72x64xf32> to vector<72x64xf32>
    %cst_70 = arith.constant dense<0.000000e+00> : vector<16x64xf32>
    %64 = tpu.matmul %61, %63, %cst_70 {dimension_numbers = #tpu.dot_dimension_numbers<[1], [0], [0], [1], [0, 0, 1, 1], [], []>} : vector<16x72xf32>, vector<72x64xf32>, vector<16x64xf32> -> vector<16x64xf32>
    %c1_71 = arith.constant 1 : index
    %c0_72 = arith.constant 0 : index
    %65 = vector.load %arg14[%c1_71, %c0_72] : memref<18x144xf32, #tpu.memory_space<vmem>>, vector<16x72xf32>
    %c1_73 = arith.constant 1 : index
    %c0_74 = arith.constant 0 : index
    %c0_75 = arith.constant 0 : index
    %66 = vector.load %arg9[%c1_73, %c0_74, %c0_75] : memref<3x72x64xf32, #tpu.memory_space<vmem>>, vector<1x72x64xf32>
    %67 = vector.shape_cast %66 : vector<1x72x64xf32> to vector<72x64xf32>
    %cst_76 = arith.constant dense<0.000000e+00> : vector<16x64xf32>
    %68 = tpu.matmul %65, %67, %cst_76 {dimension_numbers = #tpu.dot_dimension_numbers<[1], [0], [0], [1], [0, 0, 1, 1], [], []>} : vector<16x72xf32>, vector<72x64xf32>, vector<16x64xf32> -> vector<16x64xf32>
    %69 = arith.addf %64, %68 : vector<16x64xf32>
    %c2_77 = arith.constant 2 : index
    %c0_78 = arith.constant 0 : index
    %70 = vector.load %arg14[%c2_77, %c0_78] : memref<18x144xf32, #tpu.memory_space<vmem>>, vector<16x72xf32>
    %c2_79 = arith.constant 2 : index
    %c0_80 = arith.constant 0 : index
    %c0_81 = arith.constant 0 : index
    %71 = vector.load %arg9[%c2_79, %c0_80, %c0_81] : memref<3x72x64xf32, #tpu.memory_space<vmem>>, vector<1x72x64xf32>
    %72 = vector.shape_cast %71 : vector<1x72x64xf32> to vector<72x64xf32>
    %cst_82 = arith.constant dense<0.000000e+00> : vector<16x64xf32>
    %73 = tpu.matmul %70, %72, %cst_82 {dimension_numbers = #tpu.dot_dimension_numbers<[1], [0], [0], [1], [0, 0, 1, 1], [], []>} : vector<16x72xf32>, vector<72x64xf32>, vector<16x64xf32> -> vector<16x64xf32>
    %74 = arith.addf %69, %73 : vector<16x64xf32>
    %c0_83 = arith.constant 0 : index
    %c0_84 = arith.constant 0 : index
    %75 = vector.load %arg10[%c0_83, %c0_84] : memref<1x64xf32, #tpu.memory_space<vmem>>, vector<1x64xf32>
    %76 = vector.broadcast %75 : vector<1x64xf32> to vector<16x64xf32>
    %77 = arith.addf %74, %76 : vector<16x64xf32>
    %cst_85 = arith.constant 2.000000e+01 : f32
    %78 = vector.broadcast %cst_85 : f32 to vector<16x64xf32>
    %79 = arith.cmpf ogt, %77, %78 : vector<16x64xf32>
    %cst_86 = arith.constant 2.000000e+01 : f32
    %80 = vector.broadcast %cst_86 : f32 to vector<16x64xf32>
    %81 = arith.minimumf %77, %80 : vector<16x64xf32>
    %82 = math.exp %81 : vector<16x64xf32>
    %83 = math.log1p %82 : vector<16x64xf32>
    %84 = arith.select %79, %77, %83 : vector<16x64xi1>, vector<16x64xf32>
    %85 = math.tanh %84 : vector<16x64xf32>
    %86 = arith.mulf %77, %85 : vector<16x64xf32>
    %cst_87 = arith.constant 0.000000e+00 : f32
    %87 = vector.broadcast %cst_87 : f32 to vector<18x144xf32>
    %c0_88 = arith.constant 0 : index
    %c0_89 = arith.constant 0 : index
    %88 = vector.load %arg14[%c0_88, %c0_89] : memref<18x144xf32, #tpu.memory_space<vmem>>, vector<18x144xf32>
    tpu.vector_store %arg14[%c0_88, %c0_89], %87 {strides = array<i32>} : memref<18x144xf32, #tpu.memory_space<vmem>>, vector<18x144xf32>,
    %c1_90 = arith.constant 1 : index
    %c4_91 = arith.constant 4 : index
    %89 = vector.load %arg14[%c1_90, %c4_91] : memref<18x144xf32, #tpu.memory_space<vmem>>, vector<16x64xf32>
    tpu.vector_store %arg14[%c1_90, %c4_91], %86 {strides = array<i32>} : memref<18x144xf32, #tpu.memory_space<vmem>>, vector<16x64xf32>,
    %c0_92 = arith.constant 0 : index
    %c0_93 = arith.constant 0 : index
    %90 = vector.load %arg14[%c0_92, %c0_93] : memref<18x144xf32, #tpu.memory_space<vmem>>, vector<16x72xf32>
    %c0_94 = arith.constant 0 : index
    %c0_95 = arith.constant 0 : index
    %c0_96 = arith.constant 0 : index
    %91 = vector.load %arg11[%c0_94, %c0_95, %c0_96] : memref<3x72x128xf32, #tpu.memory_space<vmem>>, vector<1x72x128xf32>
    %92 = vector.shape_cast %91 : vector<1x72x128xf32> to vector<72x128xf32>
    %cst_97 = arith.constant dense<0.000000e+00> : vector<16x128xf32>
    %93 = tpu.matmul %90, %92, %cst_97 {dimension_numbers = #tpu.dot_dimension_numbers<[1], [0], [0], [1], [0, 0, 1, 1], [], []>} : vector<16x72xf32>, vector<72x128xf32>, vector<16x128xf32> -> vector<16x128xf32>
    %c1_98 = arith.constant 1 : index
    %c0_99 = arith.constant 0 : index
    %94 = vector.load %arg14[%c1_98, %c0_99] : memref<18x144xf32, #tpu.memory_space<vmem>>, vector<16x72xf32>
    %c1_100 = arith.constant 1 : index
    %c0_101 = arith.constant 0 : index
    %c0_102 = arith.constant 0 : index
    %95 = vector.load %arg11[%c1_100, %c0_101, %c0_102] : memref<3x72x128xf32, #tpu.memory_space<vmem>>, vector<1x72x128xf32>
    %96 = vector.shape_cast %95 : vector<1x72x128xf32> to vector<72x128xf32>
    %cst_103 = arith.constant dense<0.000000e+00> : vector<16x128xf32>
    %97 = tpu.matmul %94, %96, %cst_103 {dimension_numbers = #tpu.dot_dimension_numbers<[1], [0], [0], [1], [0, 0, 1, 1], [], []>} : vector<16x72xf32>, vector<72x128xf32>, vector<16x128xf32> -> vector<16x128xf32>
    %98 = arith.addf %93, %97 : vector<16x128xf32>
    %c2_104 = arith.constant 2 : index
    %c0_105 = arith.constant 0 : index
    %99 = vector.load %arg14[%c2_104, %c0_105] : memref<18x144xf32, #tpu.memory_space<vmem>>, vector<16x72xf32>
    %c2_106 = arith.constant 2 : index
    %c0_107 = arith.constant 0 : index
    %c0_108 = arith.constant 0 : index
    %100 = vector.load %arg11[%c2_106, %c0_107, %c0_108] : memref<3x72x128xf32, #tpu.memory_space<vmem>>, vector<1x72x128xf32>
    %101 = vector.shape_cast %100 : vector<1x72x128xf32> to vector<72x128xf32>
    %cst_109 = arith.constant dense<0.000000e+00> : vector<16x128xf32>
    %102 = tpu.matmul %99, %101, %cst_109 {dimension_numbers = #tpu.dot_dimension_numbers<[1], [0], [0], [1], [0, 0, 1, 1], [], []>} : vector<16x72xf32>, vector<72x128xf32>, vector<16x128xf32> -> vector<16x128xf32>
    %103 = arith.addf %98, %102 : vector<16x128xf32>
    %c0_110 = arith.constant 0 : index
    %c0_111 = arith.constant 0 : index
    %104 = vector.load %arg12[%c0_110, %c0_111] : memref<1x128xf32, #tpu.memory_space<vmem>>, vector<1x128xf32>
    %105 = vector.broadcast %104 : vector<1x128xf32> to vector<16x128xf32>
    %106 = arith.addf %103, %105 : vector<16x128xf32>
    %cst_112 = arith.constant 2.000000e+01 : f32
    %107 = vector.broadcast %cst_112 : f32 to vector<16x128xf32>
    %108 = arith.cmpf ogt, %106, %107 : vector<16x128xf32>
    %cst_113 = arith.constant 2.000000e+01 : f32
    %109 = vector.broadcast %cst_113 : f32 to vector<16x128xf32>
    %110 = arith.minimumf %106, %109 : vector<16x128xf32>
    %111 = math.exp %110 : vector<16x128xf32>
    %112 = math.log1p %111 : vector<16x128xf32>
    %113 = arith.select %108, %106, %112 : vector<16x128xi1>, vector<16x128xf32>
    %114 = math.tanh %113 : vector<16x128xf32>
    %115 = arith.mulf %106, %114 : vector<16x128xf32>
    %c0_114 = arith.constant 0 : index
    %c0_115 = arith.constant 0 : index
    %c0_116 = arith.constant 0 : index
    %116 = vector.load %arg13[%c0_114, %c0_115, %c0_116] : memref<1x16x128xf32, #tpu.memory_space<vmem>>, vector<1x16x128xf32>
    %117 = vector.shape_cast %116 : vector<1x16x128xf32> to vector<16x128xf32>
    %118 = vector.shape_cast %115 : vector<16x128xf32> to vector<1x16x128xf32>
    tpu.vector_store %arg13[%c0_114, %c0_115, %c0_116], %118 {strides = array<i32>} : memref<1x16x128xf32, #tpu.memory_space<vmem>>, vector<1x16x128xf32>,
    return
  }
  func.func @transform_0(%arg0: i32) -> (i32, i32, i32) {
    %c0_i32 = arith.constant 0 : i32
    %c0_i32_0 = arith.constant 0 : i32
    %c0_i32_1 = arith.constant 0 : i32
    return %arg0, %c0_i32, %c0_i32_0 : i32, i32, i32
  }
  func.func @transform_1(%arg0: i32) -> (i32, i32, i32) {
    %c0_i32 = arith.constant 0 : i32
    %c0_i32_0 = arith.constant 0 : i32
    %c0_i32_1 = arith.constant 0 : i32
    return %arg0, %c0_i32, %c0_i32_0 : i32, i32, i32
  }
  func.func @transform_2(%arg0: i32) -> (i32, i32) {
    %c0_i32 = arith.constant 0 : i32
    %c0_i32_0 = arith.constant 0 : i32
    %c0_i32_1 = arith.constant 0 : i32
    return %c0_i32, %c0_i32_0 : i32, i32
  }
  func.func @transform_3(%arg0: i32) -> (i32, i32) {
    %c0_i32 = arith.constant 0 : i32
    %c0_i32_0 = arith.constant 0 : i32
    %c0_i32_1 = arith.constant 0 : i32
    return %c0_i32, %c0_i32_0 : i32, i32
  }
  func.func @transform_4(%arg0: i32) -> (i32, i32, i32) {
    %c0_i32 = arith.constant 0 : i32
    %c0_i32_0 = arith.constant 0 : i32
    %c0_i32_1 = arith.constant 0 : i32
    %c0_i32_2 = arith.constant 0 : i32
    return %c0_i32, %c0_i32_0, %c0_i32_1 : i32, i32, i32
  }
  func.func @transform_5(%arg0: i32) -> (i32, i32) {
    %c0_i32 = arith.constant 0 : i32
    %c0_i32_0 = arith.constant 0 : i32
    %c0_i32_1 = arith.constant 0 : i32
    return %c0_i32, %c0_i32_0 : i32, i32
  }
  func.func @transform_6(%arg0: i32) -> (i32, i32, i32) {
    %c0_i32 = arith.constant 0 : i32
    %c0_i32_0 = arith.constant 0 : i32
    %c0_i32_1 = arith.constant 0 : i32
    %c0_i32_2 = arith.constant 0 : i32
    return %c0_i32, %c0_i32_0, %c0_i32_1 : i32, i32, i32
  }
  func.func @transform_7(%arg0: i32) -> (i32, i32) {
    %c0_i32 = arith.constant 0 : i32
    %c0_i32_0 = arith.constant 0 : i32
    %c0_i32_1 = arith.constant 0 : i32
    return %c0_i32, %c0_i32_0 : i32, i32
  }
  func.func @transform_8(%arg0: i32) -> (i32, i32, i32) {
    %c0_i32 = arith.constant 0 : i32
    %c0_i32_0 = arith.constant 0 : i32
    %c0_i32_1 = arith.constant 0 : i32
    %c0_i32_2 = arith.constant 0 : i32
    return %c0_i32, %c0_i32_0, %c0_i32_1 : i32, i32, i32
  }
  func.func @transform_9(%arg0: i32) -> (i32, i32) {
    %c0_i32 = arith.constant 0 : i32
    %c0_i32_0 = arith.constant 0 : i32
    %c0_i32_1 = arith.constant 0 : i32
    return %c0_i32, %c0_i32_0 : i32, i32
  }
  func.func @transform_10(%arg0: i32) -> (i32, i32, i32) {
    %c0_i32 = arith.constant 0 : i32
    %c0_i32_0 = arith.constant 0 : i32
    %c0_i32_1 = arith.constant 0 : i32
    %c0_i32_2 = arith.constant 0 : i32
    return %c0_i32, %c0_i32_0, %c0_i32_1 : i32, i32, i32
  }
  func.func @transform_11(%arg0: i32) -> (i32, i32) {
    %c0_i32 = arith.constant 0 : i32
    %c0_i32_0 = arith.constant 0 : i32
    %c0_i32_1 = arith.constant 0 : i32
    return %c0_i32, %c0_i32_0 : i32, i32
  }
  func.func @transform_12(%arg0: i32) -> (i32, i32, i32) {
    %c0_i32 = arith.constant 0 : i32
    %c0_i32_0 = arith.constant 0 : i32
    %c0_i32_1 = arith.constant 0 : i32
    return %arg0, %c0_i32, %c0_i32_0 : i32, i32, i32
  }
}

</mosaic_0001>

<bundles_post_ra>
// kernel: tpu_custom_call.1
= control target key start
LH: loop header
LB: loop body
LE: loop exit
PB: predicated region body
PF: predicated region fallthrough
CT: control target
= control target key end

     0   :  { %17 = vsyncpa [#allocation4], 0  ;;  %s3782_s0 = inlined_call_operand.vmem [shape: f32[2,8,32], index: 0, kind: input, shape index: {}]   ;;  %s3783_s1 = inlined_call_operand.vmem [shape: f32[2,16,64], index: 1, kind: input, shape index: {}]   ;;  %s3784_s2 = inlined_call_operand.vmem [shape: f32[16,8], index: 2, kind: input, shape index: {}]   ;;  %s3785_s3 = inlined_call_operand.vmem [shape: f32[32,64], index: 3, kind: input, shape index: {}]   ;;  %s3786_s4 = inlined_call_operand.vmem [shape: f32[3,72,64], index: 4, kind: input, shape index: {}]   ;;  %s3787_s5 = inlined_call_operand.vmem [shape: f32[1,64], index: 5, kind: input, shape index: {}]   ;;  %s3788_s6 = inlined_call_operand.vmem [shape: f32[3,144,64], index: 6, kind: input, shape index: {}]   ;;  %s3789_s7 = inlined_call_operand.vmem [shape: f32[1,64], index: 7, kind: input, shape index: {}]   ;;  %s3790_s8 = inlined_call_operand.vmem [shape: f32[3,72,64], index: 8, kind: input, shape index: {}]   ;;  %s3791_s9 = inlined_call_operand.vmem [shape: f32[1,64], index: 9, kind: input, shape index: {}]   ;;  %s3792_s10 = inlined_call_operand.vmem [shape: f32[3,72,128], index: 10, kind: input, shape index: {}]   ;;  %s3793_s11 = inlined_call_operand.vmem [shape: f32[1,128], index: 11, kind: input, shape index: {}]   ;;  %s3794_s12 = inlined_call_operand.hbm [shape: f32[2,16,128], index: 12, kind: output, shape index: {}]  }
   0x1   :  { %19 = vsyncpa [#allocation4 + $0x1], 0  ;;  %s3075_s21 = smov 0   ;;  %s3077_s22 = smov 0  }
   0x2   :  { %s3079_s23 = smov 0   ;;  %s3081_s24 = smov 0  }
   0x3 LB: > { %3800 = sst [smem:[#allocation6_spill]] %s2989_s21  ;;  %s3096_s25 = sadd.s32 4294967295, %s3001_s24   ;;  %s3001_s24 = sphi %s3081_s24, %s3809_s24   ;;  %s2997_s23 = sphi %s3079_s23, %s3811_s23   ;;  %s2993_s22 = sphi %s3077_s22, %s3813_s22   ;;  %s2989_s21 = sphi %s3075_s21, %s3812_s21  }
   0x4   : > { %3801 = sst [smem:[#allocation7_spill]] %s2997_s23  ;;  %s2163_s26 = sadd.s32 4294967294, %s3001_s24  }
   0x5   : > { %s3100_s27 = sadd.s32 1, %s3001_s24   ;;  %s294_s28 = sadd.s32 1, %s2997_s23 }
   0x6   : > { %3802 = sst [smem:[#allocation8_spill]] %s3100_s27  ;;  %s291_s29 = ssub.s32 %s3001_s24, %s3100_s27 }
   0x7   : > { %p304_p0 = scmp.ne.s32.totalorder %s2997_s23, %s2993_s22  ;;  %p292_p1 = scmp.eq.s32.totalorder %s291_s29, 0 }
   0x8   : > { %p305_p2 = scmp.eq.s32.totalorder %s3096_s25, 1  ;;  %p310_p3 = scmp.ne.s32.totalorder %s2993_s22, %s2989_s21 }
   0x9   : > { %p311_p4 = scmp.eq.s32.totalorder %s2163_s26, 1  ;;  %p2166_p7 = scmp.ge.s32.totalorder %s3001_s24, 1 }
   0xa   : > { %s3111_s30 = scalar_select %p292_p1, %s2997_s23, %s294_s28  }
   0xb   : > { %p3113_p5 = por %p305_p2, %p304_p0  ;;  %p3117_p6 = por %p311_p4, %p310_p3 }
   0xc   : > { %3803 = sst [smem:[#allocation9_spill]] %s3111_s30  ;;  %p374_p8 = scmp.lt.s32.totalorder %s3001_s24, 3 }
   0xd   : > { %s3805_s14 = scalar_select %p3117_p6, 1, 0 }
   0xe   : > { %p375_p9 = pnand %p2166_p7, %p374_p8 }
   0xf   : > { %3806 = sst [smem:[#allocation10_spill]] %s3805_s14  ;;  %p420_p10 = scmp.lt.s32.totalorder (!%p375_p9), %s3096_s25, 1  ;;  %v762_v0 = vld [vmem:[%s3784_s2] sm:$0xff] (!%p375_p9)  ;;  %vm765_vm0 = vcmask (!%p375_p9), 64512   ;;  %v2171_v1 = vld [vmem:[%s3786_s4 + $0x48] sm:$0xff] (!%p375_p9)  ;;  %v2172_v2 = vld [vmem:[%s3786_s4 + $0x50] sm:$0xff] (!%p375_p9) }
  0x10   : > { %378 = sbr.rel (%p375_p9) target bundleno = 1761 (0x6e1), region = 68  ;;  %2473 = vmatprep.mubr.msk.f32.mxu1 (!%p375_p9), %vm765_vm0, %v762_v0  ;;  %v2173_v3 = vld [vmem:[%s3786_s4 + $0x58] sm:$0xff] (!%p375_p9)  ;;  %v2613_v4 = vpack.c.bf16 (!%p375_p9), %v2172_v2, %v2171_v1  ;;  %v3003_v5 = vmov (!%p375_p9), 0.0   ;;  %v2174_v6 = vld [vmem:[%s3786_s4 + $0x60] sm:$0xff] (!%p375_p9)  ;;  %v2175_v8 = vld [vmem:[%s3786_s4 + $0x68] sm:$0xff] (!%p375_p9)  ;;  %vm441_vm1 = vcmask (!%p375_p9), 1040384  }
  0x11   : > { %431 = vst [vmem:[#allocation2] sm:$0xff] (!%p375_p9), %v3003_v5  ;;  %434 = vst [vmem:[#allocation2 + $0x10] sm:$0xff] (!%p375_p9), %v3003_v5  ;;  %v2617_v7 = vpack.c.bf16 (!%p375_p9), %v2174_v6, %v2173_v3  ;;  %v2176_v9 = vld [vmem:[%s3786_s4 + $0x70] sm:$0xff] (!%p375_p9)  ;;  %v763_v10 = vld [vmem:[%s3784_s2 + $0x8] sm:$0xff] (!%p375_p9)  ;;  %vm454_vm2 = vcmask (!%p375_p9), 556065   ;;  %vm458_vm3 = vcmask (!%p375_p9), 548896  }
  0x12   : > { %436 = vst [vmem:[#allocation2 + $0x20] sm:$0x3] (!%p375_p9), %v3003_v5  ;;  %2614 = vmatprep.subr.bf16.mxu0 (!%p375_p9), %v2613_v4  ;;  %v2621_v16 = vpack.c.bf16 (!%p375_p9), %v2176_v9, %v2175_v8  ;;  %v2177_v17 = vld [vmem:[%s3786_s4 + $0x78] sm:$0xff] (!%p375_p9)  ;;  %v2178_v18 = vld [vmem:[%s3786_s4 + $0x80] sm:$0xff] (!%p375_p9)  ;;  %v2179_v21 = vld [vmem:[%s3786_s4 + $0x88] sm:$0xff] (!%p375_p9)  ;;  %vm456_vm4 = vcmask (!%p375_p9), 556064  }
  0x13   : > { %2616 = vmatpush3.bf16.msra.mxu0 (!%p375_p9), %v2613_v4  ;;  %v2625_v20 = vpack.c.bf16 (!%p375_p9), %v2178_v18, %v2177_v17  ;;  %v462_v22 = vld [vmem:[%s3786_s4] sm:$0xff] (!%p375_p9)  ;;  %v463_v23 = vld [vmem:[%s3786_s4 + $0x8] sm:$0xff] (!%p375_p9)  ;;  %v849_v27 = vld [vmem:[%s3785_s3 + $0x10] sm:$0xff] (!%p375_p9)  ;;  %vm486_vm5 = vcmask (!%p375_p9), 1046528   ;;  %vm492_vm6 = vcmask (!%p375_p9), 588800   ;;  %vm666_vm7 = vcmask (!%p375_p9), 1045504  }
  0x14   : > { %2618 = vmatprep.subr.bf16.mxu0 (!%p375_p9), %v2617_v7  ;;  %v2629_v24 = vpack.c.bf16 (!%p375_p9), %v463_v23, %v462_v22  ;;  %v847_v25 = vld [vmem:[%s3785_s3] sm:$0xff] (!%p375_p9)  ;;  %v848_v26 = vld [vmem:[%s3785_s3 + $0x8] sm:$0xff] (!%p375_p9)  ;;  %v850_v29 = vld [vmem:[%s3785_s3 + $0x18] sm:$0xff] (!%p375_p9)  ;;  %vm851_vm8 = vcmask (!%p375_p9), 261120   ;;  %vm432_vm9 = vcmask (!%p375_p9), 130048   ;;  %vm437_vm10 = vcmask (!%p375_p9), 123904  }
  0x15   : > { %v2661_v28 = vpack.c.bf16 (!%p375_p9), %v848_v26, %v847_v25  ;;  %v2665_v30 = vpack.c.bf16 (!%p375_p9), %v850_v29, %v849_v27  ;;  %v464_v42 = vld [vmem:[%s3786_s4 + $0x10] sm:$0xff] (!%p375_p9)  ;;  %v465_v43 = vld [vmem:[%s3786_s4 + $0x18] sm:$0xff] (!%p375_p9)  ;;  %v466_v48 = vld [vmem:[%s3786_s4 + $0x20] sm:$0xff] (!%p375_p9)  ;;  %433 = vst.msk [vmem:[#allocation2 + $0x8] sm:$0xff] (!%p375_p9), %vm432_vm9, %v3003_v5  ;;  %s3006_s20 = smov (!%p375_p9), 76   ;;  %vm970_vm11 = vcmask (!%p375_p9), 1048161  }
  0x16   : > { %v2633_v47 = vpack.c.bf16 (!%p375_p9), %v465_v43, %v464_v42  ;;  %v467_v49 = vld [vmem:[%s3786_s4 + $0x28] sm:$0xff] (!%p375_p9)  ;;  %v468_v51 = vld [vmem:[%s3786_s4 + $0x30] sm:$0xff] (!%p375_p9)  ;;  %v469_v52 = vld [vmem:[%s3786_s4 + $0x38] sm:$0xff] (!%p375_p9)  ;;  %435 = vst.msk [vmem:[#allocation2 + $0x18] sm:$0xff] (!%p375_p9), %vm432_vm9, %v3003_v5  ;;  %vm972_vm12 = vcmask (!%p375_p9), 97281   ;;  %vm974_vm13 = vcmask (!%p375_p9), 1048160  }
  0x17   : > { %s421_s29 = scalar_select %p420_p10, %s3096_s25, 1  ;;  %2620 = vmatpush3.bf16.msra.mxu0 %v2617_v7  ;;  %v2637_v50 = vpack.c.bf16 %v467_v49, %v466_v48  ;;  %v2641_v53 = vpack.c.bf16 %v469_v52, %v468_v51  ;;  %v470_v54 = vld [vmem:[%s3786_s4 + $0x40] sm:$0xff]  ;;  %v2184_v55 = vld [vmem:[%s3786_s4 + $0x90] sm:$0xff]  ;;  %v2185_v56 = vld [vmem:[%s3786_s4 + $0x98] sm:$0xff]  ;;  %934 = vst.msk [vmem:[#allocation2 + $0x8] sm:$0xff] %vm432_vm9, %v3003_v5  ;;  %vm976_vm14 = vcmask 97280  }
  0x18   : > { %2622 = vmatprep.subr.bf16.mxu0 %v2621_v16  ;;  %v2186_v59 = vld [vmem:[%s3786_s4 + $0xa0] sm:$0xff]  ;;  %v2187_v60 = vld [vmem:[%s3786_s4 + $0xa8] sm:$0xff]  ;;  %v2645_v61 = vpack.c.bf16 %v2185_v56, %v2184_v55  ;;  %v2188_v0 = vld [vmem:[%s3786_s4 + $0xb0] sm:$0xff]  ;;  %936 = vst.msk [vmem:[#allocation2 + $0x18] sm:$0xff] %vm432_vm9, %v3003_v5  ;;  %vm978_vm15 = vcmask 1040992   ;;  %s2299_s30 = sshll.u32 %s3096_s25, 8 }
  0x19   : > { %s2168_s17 = sshll.u32 %s421_s29, 3  ;;  %s2298_s18 = sshll.u32 %s421_s29, 4  ;;  %v2649_v62 = vpack.c.bf16 %v2187_v60, %v2186_v59  ;;  %v2189_v1 = vld [vmem:[%s3786_s4 + $0xb8] sm:$0xff]  ;;  %v2190_v3 = vld [vmem:[%s3786_s4 + $0xc0] sm:$0xff]  ;;  %v2191_v4 = vld [vmem:[%s3786_s4 + $0xc8] sm:$0xff] }
  0x1a   : > { %s423_s27 = scalar_lea.vmem %s3782_s0, %s2168_s17  ;;  %s428_s29 = scalar_lea.vmem %s3783_s1, %s2298_s18  ;;  %v2653_v2 = vpack.c.bf16 %v2189_v1, %v2188_v0  ;;  %v2657_v6 = vpack.c.bf16 %v2191_v4, %v2190_v3  ;;  %v2192_v7 = vld [vmem:[%s3786_s4 + $0xd0] sm:$0xff]  ;;  %v2223_v17 = vld [vmem:[%s3788_s6 + $0x128] sm:$0xff]  ;;  %v2202_v18 = vld [vmem:[%s3788_s6 + $0xa0] sm:$0xff]  ;;  %438 = vst.msk [vmem:[#allocation2 + $0x28] sm:$0x3] %vm437_vm10, %v3003_v5 }
  0x1b   : > { %v764_v11 = vld [vmem:[%s423_s27] sm:$0xff]  ;;  %v430_v13 = vld [vmem:[%s428_s29 + $0x8] sm:$0xff]  ;;  %s3004_s27 = smov 4   ;;  %2624 = vmatpush3.bf16.msra.mxu0 %v2621_v16  ;;  %v2225_v22 = vld [vmem:[%s3788_s6 + $0x138] sm:$0xff]  ;;  %938 = vst.msk [vmem:[#allocation2 + $0x28] sm:$0x3] %vm437_vm10, %v3003_v5  ;;  %s3737_s19 = scalar_lea.hbm %s3794_s12, %s2299_s30 }
  0x1c   : > { %v429_v12 = vld [vmem:[%s428_s29] sm:$0xff]  ;;  %2471 = vmatprep.subr.mxu1 %v764_v11  ;;  %v443_v15 = vrot.slane %v430_v13, 7  ;;  %2626 = vmatprep.subr.bf16.mxu0 %v2625_v20  ;;  %v2201_v13 = vld [vmem:[%s3788_s6 + $0x98] sm:$0xff]  ;;  %v2204_v26 = vld [vmem:[%s3788_s6 + $0xb0] sm:$0xff]  ;;  %s417_s29 = sand.u32 1, %s2993_s22   ;;  %s3007_s26 = smov [#allocation3]  }
  0x1d   : > { %v442_v14 = vrot.slane %v429_v12, 7  ;;  %2472 = vmatpush3.msra.mxu1 %v764_v11  ;;  %v2200_v12 = vld [vmem:[%s3788_s6 + $0x90] sm:$0xff]  ;;  %v2205_v27 = vld [vmem:[%s3788_s6 + $0xb8] sm:$0xff]  ;;  %v2227_v29 = vld [vmem:[%s3788_s6 + $0x148] sm:$0xff]  ;;  %s2167_s23 = sshll.u32 %s417_s29, 4 }
  0x1e   : > { %2474 = vmatmul.mubr.msk.f32.vlgmr.msra.gmra.mrb[0].mxu1 %vm765_vm0, %v763_v10  ;;  %449 = vrot.lane.b32.xlu1 %v443_v15, %s3004_s27  ;;  %v2670_v16 = vpack.c.bf16 %v2201_v13, %v2200_v12  ;;  %v2231_v48 = vld [vmem:[%s3788_s6 + $0x168] sm:$0xff]  ;;  %v2210_v51 = vld [vmem:[%s3788_s6 + $0xe0] sm:$0xff]  ;;  %v2237_v3 = vld [vmem:[%s3788_s6 + $0x198] sm:$0xff]  ;;  %vm980_vm0 = vcmask 90112   ;;  %s419_s21 = scalar_lea.vmem [#allocation3], %s2167_s23 }
  0x1f   : > { %445 = vrot.lane.b32.xlu0 %v442_v14, %s3004_s27  ;;  %v444_v19 = vsel %vm441_vm1, %v442_v14, %v443_v15  ;;  %2628 = vmatpush3.bf16.msra.mxu0 %v2625_v20  ;;  %v2222_v14 = vld [vmem:[%s3788_s6 + $0x120] sm:$0xff]  ;;  %v3005_v15 = vmov 0.0|0.0   ;;  %v2211_v52 = vld [vmem:[%s3788_s6 + $0xe8] sm:$0xff]  ;;  %s2089_s14 = sshll.u32 %s419_s21, 4  ;;  %s3739_s14 = int_to_ptr.vmem [resolvable:$true] %s2089_s14 }
  0x20   : > { %2424 = vmatprep.subr.mxu0 %v2179_v21  ;;  %2662 = vmatprep.subr.bf16.mxu1 %v2661_v28  ;;  %v2724_v20 = vpack.c.bf16 %v2223_v17, %v2222_v14  ;;  %v2685_v55 = vpack.c.bf16 %v2211_v52, %v2210_v51  ;;  %v2234_v60 = vld [vmem:[%s3788_s6 + $0x180] sm:$0xff]  ;;  %v2215_v0 = vld [vmem:[%s3788_s6 + $0x108] sm:$0xff]  ;;  %s2939_s25 = scalar_lea.vmem %s3739_s14, 256 }
  0x21   : > { %2664 = vmatpush3.bf16.msra.mxu1 %v2661_v28  ;;  %v2226_v28 = vld [vmem:[%s3788_s6 + $0x140] sm:$0xff]  ;;  %p2940_p11 = scmp.ne.s32.totalorder %s3739_s14, %s2939_s25 }
  0x22   : > { %2666 = vmatprep.subr.bf16.mxu1 %v2665_v30 }
  0x23   : > { %447 = vrot.lane.b32.xlu0 %v444_v19, %s3004_s27  ;;  %2425 = vmatpush3.msra.mxu0 %v2179_v21  ;;  %v2203_v19 = vld [vmem:[%s3788_s6 + $0xa8] sm:$0xff]  ;;  %v2224_v21 = vld [vmem:[%s3788_s6 + $0x130] sm:$0xff]  ;;  %p2941_p12 = pnand %p2940_p11, %p3113_p5 }
  0x24   : > { %2630 = vmatprep.subr.bf16.mxu0 %v2629_v24  ;;  %v2673_v23 = vpack.c.bf16 %v2203_v19, %v2202_v18  ;;  %v2727_v25 = vpack.c.bf16 %v2225_v22, %v2224_v21 }
  0x25   : > { %2668 = vmatpush3.bf16.msra.mxu1 %v2665_v30  ;;  %p2942_p13 = pneg %p2941_p12 }
  0x26   : > { %2669 = vmatprep.subr.bf16.mxu1 %v3005_v15 }
  0x90   : > { %v450_v32 = vpop.permute.xlu1 %449 }
  0x91   : > { %v446_v31 = vpop.permute.xlu0 %445  ;;  %459 = vst.msk [vmem:[#allocation2 + $0x20] sm:$0x1] %vm458_vm3, %v450_v32 }
  0x92   : > { %455 = vst.msk [vmem:[#allocation2] sm:$0xfe] %vm454_vm2, %v446_v31 }
  0x95   : > { %v448_v33 = vpop.permute.xlu0 %447 }
  0x96   : > { %457 = vst.msk [vmem:[#allocation2 + $0x10] sm:$0xff] %vm456_vm4, %v448_v33  ;;  %v2676_v33 = vpack.c.bf16 %v2205_v27, %v2204_v26 }
  0x98   : > { %v472_v37 = vld [vmem:[#allocation2 + $0x20] sm:$0x1] }
  0x99   : > { %v471_v34 = vld [vmem:[#allocation2] sm:$0xfe]  ;;  %v490_v40 = vrot.slane %v472_v37, 1  ;;  %v2207_v37 = vld [vmem:[%s3788_s6 + $0xc8] sm:$0xff] }
  0x9a   : > { %v460_v35 = vld [vmem:[#allocation2] sm:$0xff]  ;;  %v487_v39 = vrot.slane %v471_v34, 1 }
  0x9b   : > { %v652_v36 = vld [vmem:[#allocation2] sm:$0xfc]  ;;  %v3194_v38 = vld [vmem:[#allocation2 + $0x20] sm:$0x3] }
  0x9c   : > { %933 = vst [vmem:[#allocation2] sm:$0xff] %v3003_v5  ;;  %937 = vst [vmem:[#allocation2 + $0x20] sm:$0x3] %v3003_v5  ;;  %v667_v57 = vrot.slane %v652_v36, 2  ;;  %v670_v8 = vrot.slane %v3194_v38, 2  ;;  %v2206_v36 = vld [vmem:[%s3788_s6 + $0xc0] sm:$0xff] }
  0x9d   : > { %v461_v41 = vld [vmem:[#allocation2 + $0x10] sm:$0xff]  ;;  %v2679_v42 = vpack.c.bf16 %v2207_v37, %v2206_v36 }
  0x9e   : > { %v488_v44 = vrot.slane %v461_v41, 1  ;;  %935 = vst [vmem:[#allocation2 + $0x10] sm:$0xff] %v3003_v5  ;;  %v668_v58 = vrot.slane %v461_v41, 2 }
  0xa0   : > { %v489_v45 = vsel %vm486_vm5, %v487_v39, %v488_v44  ;;  %v491_v46 = vsel %vm486_vm5, %v488_v44, %v490_v40  ;;  %v669_v63 = vsel %vm666_vm7, %v667_v57, %v668_v58  ;;  %v671_v9 = vsel %vm666_vm7, %v668_v58, %v670_v8  ;;  %v2228_v39 = vld [vmem:[%s3788_s6 + $0x150] sm:$0xff]  ;;  %v2229_v40 = vld [vmem:[%s3788_s6 + $0x158] sm:$0xff] }
  0xa1   : > { %2426 = vmatprep.mubr.msk.f32.mxu0 %vm492_vm6, %v489_v45  ;;  %v2733_v44 = vpack.c.bf16 %v2229_v40, %v2228_v39  ;;  %v2208_v45 = vld [vmem:[%s3788_s6 + $0xd0] sm:$0xff]  ;;  %v2213_v58 = vld [vmem:[%s3788_s6 + $0xf8] sm:$0xff] }
  0xa2   : > { %2427 = vmatmul.mubr.msk.f32.vlgmr.msra.gmra.mrb[0].mxu0 %vm492_vm6, %v491_v46  ;;  %v2209_v46 = vld [vmem:[%s3788_s6 + $0xd8] sm:$0xff]  ;;  %v2212_v57 = vld [vmem:[%s3788_s6 + $0xf0] sm:$0xff] }
  0xa3   : > { %2632 = vmatpush3.bf16.msra.mxu0 %v2629_v24  ;;  %2447 = vmatprep.mubr.msk.f32.mxu0 %vm492_vm6, %v460_v35  ;;  %v2195_v24 = vld [vmem:[%s3787_s5] ss:$0 sm:$0xff]  ;;  %v2730_v35 = vpack.c.bf16 %v2227_v29, %v2226_v28  ;;  %v2682_v49 = vpack.c.bf16 %v2209_v46, %v2208_v45  ;;  %v2688_v59 = vpack.c.bf16 %v2213_v58, %v2212_v57  ;;  %v988_v46 = vld [vmem:[%s3788_s6 + $0x10] sm:$0xff] }
  0xa4   : > { %2634 = vmatprep.subr.bf16.mxu0 %v2633_v47 }
  0xa7   : > { %2636 = vmatpush3.bf16.msra.mxu0 %v2633_v47  ;;  %v2230_v47 = vld [vmem:[%s3788_s6 + $0x160] sm:$0xff] }
  0xa8   : > { %2638 = vmatprep.subr.bf16.mxu0 %v2637_v50 }
  0xab   : > { %2640 = vmatpush3.bf16.msra.mxu0 %v2637_v50  ;;  %v2736_v50 = vpack.c.bf16 %v2231_v48, %v2230_v47  ;;  %v989_v47 = vld [vmem:[%s3788_s6 + $0x18] sm:$0xff] }
  0xac   : > { %2642 = vmatprep.subr.bf16.mxu0 %v2641_v53 }
  0xaf   : > { %2644 = vmatpush3.bf16.msra.mxu0 %v2641_v53  ;;  %v2232_v53 = vld [vmem:[%s3788_s6 + $0x170] sm:$0xff] }
  0xb0   : > { %2445 = vmatprep.subr.mxu0 %v470_v54 }
  0xb3   : > { %2446 = vmatpush3.msra.mxu0 %v470_v54  ;;  %v2233_v54 = vld [vmem:[%s3788_s6 + $0x178] sm:$0xff] }
  0xb4   : > { %2646 = vmatprep.subr.bf16.mxu0 %v2645_v61  ;;  %2448 = vmatmul.mubr.msk.f32.vlgmr.msra.gmra.mrb[0].mxu0 %vm492_vm6, %v461_v41  ;;  %v2739_v56 = vpack.c.bf16 %v2233_v54, %v2232_v53 }
  0xb5   : > { %2648 = vmatpush3.bf16.msra.mxu0 %v2645_v61  ;;  %2468 = vmatprep.mubr.msk.f32.mxu0 %vm492_vm6, %v669_v63  ;;  %v2235_v61 = vld [vmem:[%s3788_s6 + $0x188] sm:$0xff]  ;;  %v2214_v63 = vld [vmem:[%s3788_s6 + $0x100] sm:$0xff] }
  0xb6   : > { %2650 = vmatprep.subr.bf16.mxu0 %v2649_v62  ;;  %v2691_v1 = vpack.c.bf16 %v2215_v0, %v2214_v63 }
  0xb9   : > { %2652 = vmatpush3.bf16.msra.mxu0 %v2649_v62  ;;  %v2742_v62 = vpack.c.bf16 %v2235_v61, %v2234_v60  ;;  %v990_v61 = vld [vmem:[%s3788_s6 + $0x20] sm:$0xff] }
  0xba   : > { %2654 = vmatprep.subr.bf16.mxu0 %v2653_v2 }
  0xbd   : > { %2656 = vmatpush3.bf16.msra.mxu0 %v2653_v2  ;;  %v2236_v2 = vld [vmem:[%s3788_s6 + $0x190] sm:$0xff] }
  0xbe   : > { %2658 = vmatprep.subr.bf16.mxu0 %v2657_v6  ;;  %v2745_v4 = vpack.c.bf16 %v2237_v3, %v2236_v2  ;;  %v993_v2 = vld [vmem:[%s3788_s6 + $0x38] sm:$0xff] }
  0xc1   : > { %2660 = vmatpush3.bf16.msra.mxu0 %v2657_v6  ;;  %v2216_v6 = vld [vmem:[%s3788_s6 + $0x110] sm:$0xff] }
  0xc2   : > { %2466 = vmatprep.subr.mxu0 %v2192_v7 }
  0xc5   : > { %2467 = vmatpush3.msra.mxu0 %v2192_v7  ;;  %v2217_v7 = vld [vmem:[%s3788_s6 + $0x118] sm:$0xff] }
  0xc6   : > { %2469 = vmatmul.mubr.msk.f32.vlgmr.msra.gmra.mrb[0].mxu0 %vm492_vm6, %v671_v9  ;;  %2723 = vmatprep.subr.bf16.mxu0 %v3005_v15  ;;  %v2694_v8 = vpack.c.bf16 %v2217_v7, %v2216_v6  ;;  %v2238_v9 = vld [vmem:[%s3788_s6 + $0x1a0] sm:$0xff]  ;;  %v995_v6 = vld [vmem:[%s3788_s6 + $0x48] sm:$0xff] }
  0xc7   : > { %2725 = vmatpush1.bf16.msra.mxu0 %v2724_v20 }
  0xc8   : > { %2726 = vmatprep.subr.bf16.mxu0 %v3005_v15 }
  0xcb   : > { %2728 = vmatpush1.bf16.msra.mxu0 %v2727_v25  ;;  %v987_v25 = vld [vmem:[%s3788_s6 + $0x8] sm:$0xff] }
  0xcc   : > { %2729 = vmatprep.subr.bf16.mxu0 %v3005_v15 }
  0xcf   : > { %2731 = vmatpush1.bf16.msra.mxu0 %v2730_v35 }
  0xd0   : > { %2732 = vmatprep.subr.bf16.mxu0 %v3005_v15 }
  0xd3   : > { %2734 = vmatpush1.bf16.msra.mxu0 %v2733_v44 }
  0xd4   : > { %2735 = vmatprep.subr.bf16.mxu0 %v3005_v15 }
  0xd7   : > { %2737 = vmatpush1.bf16.msra.mxu0 %v2736_v50 }
  0xd8   : > { %2738 = vmatprep.subr.bf16.mxu0 %v3005_v15 }
  0xdb   : > { %2740 = vmatpush1.bf16.msra.mxu0 %v2739_v56  ;;  %v2700_v56 = vpack.c.bf16 %v989_v47, %v988_v46 }
  0xdc   : > { %2741 = vmatprep.subr.bf16.mxu0 %v3005_v15 }
  0xdf   : > { %2743 = vmatpush1.bf16.msra.mxu0 %v2742_v62  ;;  %v991_v62 = vld [vmem:[%s3788_s6 + $0x28] sm:$0xff] }
  0xe0   : > { %2744 = vmatprep.subr.bf16.mxu0 %v3005_v15  ;;  %v2703_v0 = vpack.c.bf16 %v991_v62, %v990_v61 }
  0xe3   : > { %2746 = vmatpush1.bf16.msra.mxu0 %v2745_v4  ;;  %v994_v4 = vld [vmem:[%s3788_s6 + $0x40] sm:$0xff] }
  0xe4   : > { %2747 = vmatprep.subr.bf16.mxu0 %v3005_v15  ;;  %v2709_v7 = vpack.c.bf16 %v995_v6, %v994_v4  ;;  %v2247_v6 = vld [vmem:[%s3790_s8 + $0x68] sm:$0xff] }
  0xf1   : > { %v2475_v10 = vpop.f32.mrb[0].mxu1 }
  0xf2   : > { %v838_v11 = vpop.f32.mrb[1].mxu1 }
  0xf3   : > { %2484 = vmatprep.mubr.msk.f32.mxu1 %vm851_vm8, %v838_v11 }
  0xf4   : > { %2485 = vmatmul.mubr.msk.f32.vlgmr.msra.gmra.mrb[2].mxu1 %vm851_vm8, %v2475_v10  ;;  %v2239_v10 = vld [vmem:[%s3788_s6 + $0x1a8] sm:$0xff] }
  0xf5   : > { %2671 = vmatpush1.bf16.msra.mxu1 %v2670_v16  ;;  %v2748_v11 = vpack.c.bf16 %v2239_v10, %v2238_v9  ;;  %v997_v9 = vld [vmem:[%s3788_s6 + $0x58] sm:$0xff] }
  0xf6   : > { %2672 = vmatprep.subr.bf16.mxu1 %v3005_v15 }
  0xf7   : > { %2749 = vmatpush1.bf16.msra.mxu0 %v2748_v11  ;;  %v998_v11 = vld [vmem:[%s3788_s6 + $0x60] sm:$0xff] }
  0xf9   : > { %2674 = vmatpush1.bf16.msra.mxu1 %v2673_v23 }
  0xfa   : > { %2675 = vmatprep.subr.bf16.mxu1 %v3005_v15 }
  0xfd   : > { %2677 = vmatpush1.bf16.msra.mxu1 %v2676_v33 }
  0xfe   : > { %2678 = vmatprep.subr.bf16.mxu1 %v3005_v15 }
 0x101   : > { %2680 = vmatpush1.bf16.msra.mxu1 %v2679_v42 }
 0x102   : > { %2681 = vmatprep.subr.bf16.mxu1 %v3005_v15 }
 0x105   : > { %2683 = vmatpush1.bf16.msra.mxu1 %v2682_v49 }
 0x106   : > { %2684 = vmatprep.subr.bf16.mxu1 %v3005_v15 }
 0x109   : > { %2686 = vmatpush1.bf16.msra.mxu1 %v2685_v55 }
 0x10a   : > { %2687 = vmatprep.subr.bf16.mxu1 %v3005_v15 }
 0x10d   : > { %2689 = vmatpush1.bf16.msra.mxu1 %v2688_v59 }
 0x10e   : > { %2690 = vmatprep.subr.bf16.mxu1 %v3005_v15 }
 0x111   : > { %2692 = vmatpush1.bf16.msra.mxu1 %v2691_v1  ;;  %v992_v1 = vld [vmem:[%s3788_s6 + $0x30] sm:$0xff] }
 0x112   : > { %2693 = vmatprep.subr.bf16.mxu1 %v3005_v15  ;;  %v2706_v3 = vpack.c.bf16 %v993_v2, %v992_v1  ;;  %v2245_v1 = vld [vmem:[%s3790_s8 + $0x58] sm:$0xff]  ;;  %v2246_v2 = vld [vmem:[%s3790_s8 + $0x60] sm:$0xff] }
 0x113   : > { %v2754_v4 = vpack.c.bf16 %v2246_v2, %v2245_v1  ;;  %v2269_v1 = vld [vmem:[%s3792_s10 + $0x50] sm:$0xff] }
 0x115   : > { %2695 = vmatpush1.bf16.msra.mxu1 %v2694_v8  ;;  %v996_v8 = vld [vmem:[%s3788_s6 + $0x50] sm:$0xff] }
 0x116   : > { %2696 = vmatprep.subr.bf16.mxu1 %v3005_v15  ;;  %v2712_v10 = vpack.c.bf16 %v997_v9, %v996_v8  ;;  %v2249_v8 = vld [vmem:[%s3790_s8 + $0x78] sm:$0xff] }
 0x199   : > { %v2470_v30 = vpop.f32.mrb[0].mxu0 }
 0x19a   : > { %v3309_v31 = vadd.f32 %v2470_v30, %v2195_v24  ;;  %v742_v32 = vpop.f32.mrb[1].mxu0 }
 0x19b   : > { %v760_v34 = vadd.f32 %v2195_v24, %v742_v32  ;;  %v986_v24 = vld [vmem:[%s3788_s6] sm:$0xff] }
 0x19c   : > { %v942_v38 = vrot.slane %v3309_v31, 7  ;;  %v2697_v40 = vpack.c.bf16 %v987_v25, %v986_v24 }
 0x19d   : > { %v941_v41 = vrot.slane %v760_v34, 7 }
 0x19f   : > { %944 = vrot.lane.b32.xlu1 %v941_v41, %s3004_s27  ;;  %v943_v43 = vsel %vm441_vm1, %v941_v41, %v942_v38 }
 0x1a0   : > { %946 = vrot.lane.b32.xlu0 %v943_v43, %s3004_s27 }
 0x1c7   : > { %v2486_v12 = vpop.f32.mrb[2].mxu1 }
 0x1c8   : > { %v959_v13 = vrot.slane %v2486_v12, 7  ;;  %v924_v14 = vpop.f32.mrb[3].mxu1  ;;  %v999_v12 = vld [vmem:[%s3788_s6 + $0x68] sm:$0xff] }
 0x1c9   : > { %v958_v16 = vrot.slane %v924_v14, 7  ;;  %v1000_v14 = vld [vmem:[%s3788_s6 + $0x70] sm:$0xff] }
 0x1cb   : > { %961 = vrot.lane.b32.xlu1 %v958_v16, %s3006_s20  ;;  %v960_v17 = vsel %vm441_vm1, %v958_v16, %v959_v13  ;;  %v1001_v16 = vld [vmem:[%s3788_s6 + $0x78] sm:$0xff] }
 0x1cc   : > { %963 = vrot.lane.b32.xlu0 %v960_v17, %s3006_s20  ;;  %v2718_v17 = vpack.c.bf16 %v1001_v16, %v1000_v14  ;;  %v2251_v16 = vld [vmem:[%s3790_s8 + $0x88] sm:$0xff] }
 0x1cf   : > { %948 = vrot.lane.b32.xlu1 %v942_v38, %s3004_s27 }
 0x1d0   : > { %965 = vrot.lane.b32.xlu0 %v959_v13, %s3006_s20  ;;  %v2715_v13 = vpack.c.bf16 %v999_v12, %v998_v11  ;;  %s3741_s20 = scalar_lea.sflag [#allocation4], %s417_s29 }
 0x211   : > { %v945_v18 = vpop.permute.xlu1 %944 }
 0x212   : > { %953 = vst.msk [vmem:[#allocation2] sm:$0xfe] %vm454_vm2, %v945_v18  ;;  %v947_v19 = vpop.permute.xlu0 %946  ;;  %v1002_v18 = vld [vmem:[%s3788_s6 + $0x80] sm:$0xff] }
 0x213   : > { %954 = vst.msk [vmem:[#allocation2 + $0x10] sm:$0xff] %vm456_vm4, %v947_v19  ;;  %v1003_v19 = vld [vmem:[%s3788_s6 + $0x88] sm:$0xff] }
 0x23d   : > { %v962_v20 = vpop.permute.xlu1 %961 }
 0x23e   : > { %971 = vst.msk [vmem:[#allocation2] sm:$0xfe] %vm970_vm11, %v962_v20  ;;  %v964_v21 = vpop.permute.xlu0 %963 }
 0x23f   : > { %973 = vst.msk [vmem:[#allocation2 + $0x8] sm:$0xfe] %vm972_vm12, %v962_v20  ;;  %v2721_v20 = vpack.c.bf16 %v1003_v19, %v1002_v18 }
 0x240   : > { %975 = vst.msk [vmem:[#allocation2 + $0x10] sm:$0xff] %vm974_vm13, %v964_v21 }
 0x241   : > { %977 = vst.msk [vmem:[#allocation2 + $0x18] sm:$0xff] %vm976_vm14, %v964_v21  ;;  %v949_v22 = vpop.permute.xlu1 %948  ;;  %v2243_v21 = vld [vmem:[%s3790_s8 + $0x48] sm:$0xff] }
 0x242   : > { %955 = vst.msk [vmem:[#allocation2 + $0x20] sm:$0x1] %vm458_vm3, %v949_v22  ;;  %v966_v23 = vpop.permute.xlu0 %965  ;;  %v2244_v22 = vld [vmem:[%s3790_s8 + $0x50] sm:$0xff] }
 0x243   : > { %979 = vst.msk [vmem:[#allocation2 + $0x20] sm:$0x1] %vm978_vm15, %v966_v23 }
 0x244   : > { %981 = vst.msk [vmem:[#allocation2 + $0x28] sm:$0x1] %vm980_vm0, %v966_v23  ;;  %v2750_v23 = vpack.c.bf16 %v2244_v22, %v2243_v21  ;;  %v1391_v21 = vld [vmem:[%s3790_s8 + $0x8] sm:$0xff] }
 0x245   : > { %v1004_v28 = vld [vmem:[#allocation2] sm:$0xfe] }
 0x246   : > { %v1005_v26 = vld [vmem:[#allocation2 + $0x8] sm:$0xfe]  ;;  %v1033_v33 = vrot.slane %v1004_v28, 1  ;;  %v1204_v38 = vld [vmem:[#allocation2] sm:$0xfc] }
 0x247   : > { %v1205_v27 = vld [vmem:[#allocation2 + $0x8] sm:$0xfc]  ;;  %v1036_v30 = vrot.slane %v1005_v26, 1  ;;  %v3423_v32 = vld [vmem:[#allocation2 + $0x10] sm:$0xff]  ;;  %v1231_v41 = vrot.slane %v1204_v38, 2  ;;  %v3438_v42 = vld [vmem:[#allocation2] sm:$0xff] }
 0x248   : > { %v3421_v29 = vld [vmem:[#allocation2 + $0x18] sm:$0xff]  ;;  %v1234_v31 = vrot.slane %v1205_v27, 2  ;;  %v983_v34 = vld [vmem:[#allocation2 + $0x8] sm:$0xff]  ;;  %v1034_v37 = vrot.slane %v3423_v32, 1  ;;  %1367 = vst [vmem:[#allocation2 + $0x10] sm:$0xff] %v3003_v5  ;;  %v1232_v39 = vrot.slane %v3423_v32, 2 }
 0x249   : > { %1368 = vst.msk [vmem:[#allocation2 + $0x18] sm:$0xff] %vm432_vm9, %v3003_v5  ;;  %v1037_v35 = vrot.slane %v3421_v29, 1  ;;  %v1235_v36 = vrot.slane %v3421_v29, 2  ;;  %1366 = vst.msk [vmem:[#allocation2 + $0x8] sm:$0xff] %vm432_vm9, %v3003_v5 }
 0x24a   : > { %1722 = vst.msk [vmem:[#allocation2 + $0x18] sm:$0xff] %vm432_vm9, %v3003_v5  ;;  %1720 = vst.msk [vmem:[#allocation2 + $0x8] sm:$0xff] %vm432_vm9, %v3003_v5  ;;  %v1035_v45 = vsel %vm486_vm5, %v1033_v33, %v1034_v37  ;;  %v1233_v48 = vsel %vm666_vm7, %v1231_v41, %v1232_v39  ;;  %v1006_v51 = vld [vmem:[#allocation2 + $0x20] sm:$0x1] }
 0x24b   : > { %v1038_v43 = vsel %vm486_vm5, %v1036_v30, %v1037_v35  ;;  %v1236_v44 = vsel %vm666_vm7, %v1234_v31, %v1235_v36  ;;  %1365 = vst [vmem:[#allocation2] sm:$0xff] %v3003_v5  ;;  %v1007_v49 = vld [vmem:[#allocation2 + $0x28] sm:$0x1]  ;;  %v1039_v54 = vrot.slane %v1006_v51, 1  ;;  %v1206_v55 = vld [vmem:[#allocation2 + $0x20] sm:$0x3] }
 0x24c   : > { %2218 = vmatprep.mubr.msk.f32.mxu1 %vm432_vm9, %v1038_v43  ;;  %2240 = vmatprep.mubr.msk.f32.mxu0 %vm432_vm9, %v1236_v44  ;;  %v1207_v50 = vld [vmem:[#allocation2 + $0x28] sm:$0x3]  ;;  %v1041_v52 = vrot.slane %v1007_v49, 1  ;;  %v1237_v57 = vrot.slane %v1206_v55, 2  ;;  %1369 = vst [vmem:[#allocation2 + $0x20] sm:$0x3] %v3003_v5 }
 0x24d   : > { %1114 = vmatmul.mubr.f32.vlgmr.msra.gmra.mrb[4].mxu1 %v1035_v45  ;;  %1312 = vmatmul.mubr.f32.vlgmr.msra.gmra.mrb[2].mxu0 %v1233_v48  ;;  %v1239_v53 = vrot.slane %v1207_v50, 2  ;;  %1370 = vst.msk [vmem:[#allocation2 + $0x28] sm:$0x3] %vm437_vm10, %v3003_v5  ;;  %v1040_v60 = vsel %vm486_vm5, %v1034_v37, %v1039_v54 }
 0x24e   : > { %2698 = vmatpush1.bf16.msra.mxu1 %v2697_v40  ;;  %1724 = vst.msk [vmem:[#allocation2 + $0x28] sm:$0x3] %vm437_vm10, %v3003_v5  ;;  %v1042_v58 = vsel %vm486_vm5, %v1037_v35, %v1041_v52  ;;  %v1238_v63 = vsel %vm666_vm7, %v1232_v39, %v1237_v57 }
 0x24f   : > { %2699 = vmatprep.subr.bf16.mxu1 %v3005_v15  ;;  %v1240_v59 = vsel %vm666_vm7, %v1235_v36, %v1239_v53  ;;  %2219 = vmatprep.mubr.msk.f32.mxu1 %vm432_vm9, %v1042_v58 }
 0x250   : > { %2241 = vmatprep.mubr.msk.f32.mxu0 %vm432_vm9, %v1240_v59 }
 0x251   : > { %1119 = vmatmul.mubr.f32.gmra.mrb[6].mxu1 %v1040_v60  ;;  %1317 = vmatmul.mubr.f32.gmra.mrb[4].mxu0 %v1238_v63 }
 0x252   : > { %2701 = vmatpush1.bf16.msra.mxu1 %v2700_v56  ;;  %2220 = vmatprep.mubr.msk.f32.mxu1 %vm432_vm9, %v983_v34  ;;  %v2242_v34 = vld [vmem:[%s3789_s7] ss:$0 sm:$0xff] }
 0x253   : > { %2702 = vmatprep.subr.bf16.mxu1 %v3005_v15 }
 0x256   : > { %2704 = vmatpush1.bf16.msra.mxu1 %v2703_v0 }
 0x257   : > { %2705 = vmatprep.subr.bf16.mxu1 %v3005_v15 }
 0x25a   : > { %2707 = vmatpush1.bf16.msra.mxu1 %v2706_v3 }
 0x25b   : > { %2708 = vmatprep.subr.bf16.mxu1 %v3005_v15 }
 0x25e   : > { %2710 = vmatpush1.bf16.msra.mxu1 %v2709_v7  ;;  %v2248_v7 = vld [vmem:[%s3790_s8 + $0x70] sm:$0xff] }
 0x25f   : > { %2711 = vmatprep.subr.bf16.mxu1 %v3005_v15  ;;  %v2758_v9 = vpack.c.bf16 %v2248_v7, %v2247_v6 }
 0x262   : > { %2713 = vmatpush1.bf16.msra.mxu1 %v2712_v10  ;;  %v2250_v10 = vld [vmem:[%s3790_s8 + $0x80] sm:$0xff] }
 0x263   : > { %2714 = vmatprep.subr.bf16.mxu1 %v3005_v15  ;;  %v2762_v11 = vpack.c.bf16 %v2250_v10, %v2249_v8 }
 0x266   : > { %2716 = vmatpush1.bf16.msra.mxu1 %v2715_v13 }
 0x267   : > { %2717 = vmatprep.subr.bf16.mxu1 %v3005_v15 }
 0x26a   : > { %2719 = vmatpush1.bf16.msra.mxu1 %v2718_v17 }
 0x26b   : > { %2720 = vmatprep.subr.bf16.mxu1 %v3005_v15 }
 0x26e   : > { %2722 = vmatpush1.bf16.msra.mxu1 %v2721_v20  ;;  %v1390_v20 = vld [vmem:[%s3790_s8] sm:$0xff] }
 0x26f   : > { %2751 = vmatprep.subr.bf16.mxu1 %v2750_v23  ;;  %v2766_v22 = vpack.c.bf16 %v1391_v21, %v1390_v20 }
 0x271   : > { %1194 = vmatmul.mubr.f32.vlgmr.msra.gmra.mrb[8].mxu1 %v3438_v42 }
 0x272   : > { %2221 = vmatprep.mubr.msk.f32.mxu1 %vm432_vm9, %v3421_v29  ;;  %2753 = vmatpush3.bf16.msra.mxu1 %v2750_v23 }
 0x273   : > { %2755 = vmatprep.subr.bf16.mxu1 %v2754_v4 }
 0x275   : > { %1199 = vmatmul.mubr.f32.gmra.mrb[10].mxu1 %v3423_v32 }
 0x276   : > { %2757 = vmatpush3.bf16.msra.mxu1 %v2754_v4 }
 0x277   : > { %2759 = vmatprep.subr.bf16.mxu1 %v2758_v9 }
 0x27a   : > { %2761 = vmatpush3.bf16.msra.mxu1 %v2758_v9 }
 0x27b   : > { %2763 = vmatprep.subr.bf16.mxu1 %v2762_v11 }
 0x27e   : > { %2765 = vmatpush3.bf16.msra.mxu1 %v2762_v11 }
 0x27f   : > { %2503 = vmatprep.subr.mxu1 %v2251_v16 }
 0x282   : > { %2504 = vmatpush3.msra.mxu1 %v2251_v16 }
 0x283   : > { %2767 = vmatprep.subr.bf16.mxu1 %v2766_v22 }
 0x320   : > { %v1115_v15 = vpop.f32.mrb[4].mxu1  ;;  %v1313_v24 = vpop.f32.mrb[2].mxu0 }
 0x321   : > { %v1117_v25 = vpop.f32.mrb[5].mxu1  ;;  %v1315_v26 = vpop.f32.mrb[3].mxu0 }
 0x324   : > { %v1120_v27 = vpop.f32.mrb[6].mxu1  ;;  %v1318_v28 = vpop.f32.mrb[4].mxu0 }
 0x325   : > { %v1122_v29 = vpop.f32.mrb[7].mxu1  ;;  %v1320_v30 = vpop.f32.mrb[5].mxu0 }
 0x344   : > { %v1195_v31 = vpop.f32.mrb[8].mxu1 }
 0x345   : > { %v1196_v32 = vadd.f32 %v1195_v31, %v1115_v15  ;;  %v1197_v33 = vpop.f32.mrb[9].mxu1 }
 0x346   : > { %v1392_v33 = vld [vmem:[%s3790_s8 + $0x10] sm:$0xff] }
 0x347   : > { %v1322_v35 = vadd.f32 %v1313_v24, %v1196_v32 }
 0x348   : > { %v1200_v36 = vpop.f32.mrb[10].mxu1 }
 0x349   : > { %v1331_v37 = vadd.f32 %v2242_v34, %v1322_v35  ;;  %v1201_v38 = vadd.f32 %v1200_v36, %v1120_v27  ;;  %v1202_v39 = vpop.f32.mrb[11].mxu1 }
 0x34b   : > { %v1335_v40 = vmin.f32 %v1331_v37, 20.0  ;;  %v1323_v41 = vadd.f32 %v1318_v28, %v1201_v38  ;;  %vm1333_vm9 = vcmp.gt.f32.partialorder %v1331_v37, 20.0 }
 0x34d   : > { %v1337_v42 = vmul.f32 1.442695, %v1335_v40  ;;  %v1332_v43 = vadd.f32 %v2242_v34, %v1323_v41  ;;  %v1393_v34 = vld [vmem:[%s3790_s8 + $0x18] sm:$0xff]  ;;  %v1394_v40 = vld [vmem:[%s3790_s8 + $0x20] sm:$0xff]  ;;  %v1395_v41 = vld [vmem:[%s3790_s8 + $0x28] sm:$0xff] }
 0x34e   : > { %v2770_v39 = vpack.c.bf16 %v1393_v34, %v1392_v33  ;;  %v2270_v33 = vld [vmem:[%s3792_s10 + $0x58] sm:$0xff]  ;;  %v2271_v34 = vld [vmem:[%s3792_s10 + $0x60] sm:$0xff] }
 0x34f   : > { %2903 = vpow2.f32 %v1337_v42  ;;  %v1336_v44 = vmin.f32 %v1332_v43, 20.0  ;;  %vm1334_vm11 = vcmp.gt.f32.partialorder %v1332_v43, 20.0  ;;  %v1396_v42 = vld [vmem:[%s3790_s8 + $0x30] sm:$0xff] }
 0x351   : > { %v1339_v45 = vmul.f32 1.442695, %v1336_v44 }
 0x353   : > { %2905 = vpow2.f32 %v1339_v45  ;;  %v1398_v45 = vld [vmem:[%s3790_s8 + $0x40] sm:$0xff] }
 0x359   : > { %v2904_v46 = vpop.eup %2903 }
 0x35a   : > { %v1341_v47 = vadd.f32 1.0, %v2904_v46  ;;  %v1344_v50 = vmul.f32 -0.5, %v2904_v46  ;;  %v1347_v53 = vand.u32 2147483647, %v2904_v46 }
 0x35c   : > { %2907 = vlog2.f32 %v1341_v47  ;;  %v1345_v51 = vadd.f32 1.0, %v1344_v50  ;;  %vm1348_vm8 = vcmp.lt.f32.partialorder %v1347_v53, 0.0004427343  ;;  %v2257_v47 = vld [vmem:[%s3790_s8 + $0x98] sm:$0xff] }
 0x35d   : > { %v2906_v48 = vpop.eup %2905 }
 0x35e   : > { %v1350_v49 = vadd.f32 1.0, %v2906_v48  ;;  %v1353_v52 = vmul.f32 -0.5, %v2906_v48  ;;  %v1346_v56 = vmul.f32 %v2904_v46, %v1345_v51  ;;  %v1356_v58 = vand.u32 2147483647, %v2906_v48  ;;  %v2256_v46 = vld [vmem:[%s3790_s8 + $0x90] sm:$0xff] }
 0x35f   : > { %v2782_v50 = vpack.c.bf16 %v2257_v47, %v2256_v46 }
 0x360   : > { %2909 = vlog2.f32 %v1350_v49  ;;  %v1354_v57 = vadd.f32 1.0, %v1353_v52  ;;  %vm1357_vm10 = vcmp.lt.f32.partialorder %v1356_v58, 0.0004427343  ;;  %v2259_v49 = vld [vmem:[%s3790_s8 + $0xa8] sm:$0xff]  ;;  %v2262_v58 = vld [vmem:[%s3790_s8 + $0xc0] sm:$0xff] }
 0x362   : > { %v1355_v63 = vmul.f32 %v2906_v48, %v1354_v57  ;;  %v2258_v48 = vld [vmem:[%s3790_s8 + $0xa0] sm:$0xff] }
 0x363   : > { %v2786_v53 = vpack.c.bf16 %v2259_v49, %v2258_v48  ;;  %v1744_v48 = vld [vmem:[%s3792_s10] sm:$0xff]  ;;  %v1745_v49 = vld [vmem:[%s3792_s10 + $0x8] sm:$0xff] }
 0x366   : > { %v2908_v54 = vpop.eup %2907 }
 0x367   : > { %v1343_v55 = vmul.f32 0.6931472, %v2908_v54  ;;  %v2260_v54 = vld [vmem:[%s3790_s8 + $0xb0] sm:$0xff] }
 0x369   : > { %v1349_v59 = vsel %vm1348_vm8, %v1346_v56, %v1343_v55  ;;  %v2261_v55 = vld [vmem:[%s3790_s8 + $0xb8] sm:$0xff] }
 0x36a   : > { %v2910_v60 = vpop.eup %2909  ;;  %v1359_v61 = vsel %vm1333_vm9, %v1331_v37, %v1349_v59  ;;  %v2790_v57 = vpack.c.bf16 %v2261_v55, %v2260_v54  ;;  %v2263_v59 = vld [vmem:[%s3790_s8 + $0xc8] sm:$0xff] }
 0x36b   : > { %2911 = vtanh.f32 %v1359_v61  ;;  %v1352_v62 = vmul.f32 0.6931472, %v2910_v60  ;;  %v2794_v60 = vpack.c.bf16 %v2263_v59, %v2262_v58  ;;  %v2264_v61 = vld [vmem:[%s3790_s8 + $0xd0] sm:$0xff] }
 0x36c   : > { %v1746_v59 = vld [vmem:[%s3792_s10 + $0x10] sm:$0xff] }
 0x36d   : > { %v1358_v0 = vsel %vm1357_vm10, %v1355_v63, %v1352_v62 }
 0x36e   : > { %v1360_v3 = vsel %vm1334_vm11, %v1332_v43, %v1358_v0  ;;  %v2268_v0 = vld [vmem:[%s3792_s10 + $0x48] sm:$0xff] }
 0x36f   : > { %2913 = vtanh.f32 %v1360_v3  ;;  %v2798_v2 = vpack.c.bf16 %v2269_v1, %v2268_v0  ;;  %v2267_v3 = vld [vmem:[%s3791_s9] ss:$0 sm:$0xff] }
 0x371   : > { %2799 = vmatprep.subr.bf16.mxu0 %v2798_v2 }
 0x372   : > { %2801 = vmatpush3.bf16.msra.mxu0 %v2798_v2  ;;  %v1748_v2 = vld [vmem:[%s3792_s10 + $0x20] sm:$0xff] }
 0x375   : > { %v2912_v12 = vpop.eup %2911 }
 0x376   : > { %v1363_v13 = vmul.f32 %v2912_v12, %v1331_v37 }
 0x378   : > { %v1373_v14 = vrot.slane %v1363_v13, 7 }
 0x379   : > { %v2914_v17 = vpop.eup %2913 }
 0x37a   : > { %1376 = vrot.lane.b32.xlu1 %v1373_v14, %s3004_s27  ;;  %v1364_v18 = vmul.f32 %v2914_v17, %v1332_v43  ;;  %v1397_v43 = vld [vmem:[%s3790_s8 + $0x38] sm:$0xff] }
 0x37b   : > { %v2778_v44 = vpack.c.bf16 %v1397_v43, %v1396_v42 }
 0x37c   : > { %v1374_v19 = vrot.slane %v1364_v18, 7 }
 0x37e   : > { %1380 = vrot.lane.b32.xlu1 %v1374_v19, %s3004_s27  ;;  %v1375_v23 = vsel %vm441_vm1, %v1373_v14, %v1374_v19 }
 0x37f   : > { %1378 = vrot.lane.b32.xlu0 %v1375_v23, %s3004_s27 }
 0x3ec   : > { %v1377_v15 = vpop.permute.xlu1 %1376 }
 0x3ed   : > { %1385 = vst.msk [vmem:[#allocation2] sm:$0xfe] %vm454_vm2, %v1377_v15 }
 0x3f0   : > { %v1381_v24 = vpop.permute.xlu1 %1380 }
 0x3f1   : > { %1387 = vst.msk [vmem:[#allocation2 + $0x20] sm:$0x1] %vm458_vm3, %v1381_v24  ;;  %v1379_v25 = vpop.permute.xlu0 %1378 }
 0x3f2   : > { %1386 = vst.msk [vmem:[#allocation2 + $0x10] sm:$0xff] %vm456_vm4, %v1379_v25 }
 0x3f4   : > { %v1399_v26 = vld [vmem:[#allocation2] sm:$0xfe] }
 0x3f5   : > { %v1388_v27 = vld [vmem:[#allocation2] sm:$0xff]  ;;  %v1414_v35 = vrot.slane %v1399_v26, 1 }
 0x3f6   : > { %v1578_v28 = vld [vmem:[#allocation2] sm:$0xfc] }
 0x3f7   : > { %1719 = vst [vmem:[#allocation2] sm:$0xff] %v3003_v5  ;;  %v1592_v52 = vrot.slane %v1578_v28, 2 }
 0x3f8   : > { %v1400_v29 = vld [vmem:[#allocation2 + $0x20] sm:$0x1] }
 0x3f9   : > { %v1579_v30 = vld [vmem:[#allocation2 + $0x20] sm:$0x3]  ;;  %v1389_v31 = vld [vmem:[#allocation2 + $0x10] sm:$0xff]  ;;  %v1417_v32 = vrot.slane %v1400_v29, 1 }
 0x3fa   : > { %1723 = vst [vmem:[#allocation2 + $0x20] sm:$0x3] %v3003_v5  ;;  %v1415_v36 = vrot.slane %v1389_v31, 1  ;;  %1721 = vst [vmem:[#allocation2 + $0x10] sm:$0xff] %v3003_v5  ;;  %v2774_v5 = vpack.c.bf16 %v1395_v41, %v1394_v40  ;;  %v1593_v51 = vrot.slane %v1389_v31, 2  ;;  %v1595_v62 = vrot.slane %v1579_v30, 2 }
 0x3fb   : > { %v2275_v40 = vld [vmem:[%s3792_s10 + $0x80] sm:$0xff] }
 0x3fc   : > { %v1416_v37 = vsel %vm486_vm5, %v1414_v35, %v1415_v36  ;;  %v1418_v38 = vsel %vm486_vm5, %v1415_v36, %v1417_v32  ;;  %v1594_v56 = vsel %vm666_vm7, %v1592_v52, %v1593_v51  ;;  %v1596_v63 = vsel %vm666_vm7, %v1593_v51, %v1595_v62  ;;  %v2272_v36 = vld [vmem:[%s3792_s10 + $0x68] sm:$0xff] }
 0x3fd   : > { %2505 = vmatprep.mubr.msk.f32.mxu1 %vm492_vm6, %v1416_v37  ;;  %v2802_v35 = vpack.c.bf16 %v2271_v34, %v2270_v33  ;;  %v2273_v37 = vld [vmem:[%s3792_s10 + $0x70] sm:$0xff]  ;;  %v2814_v51 = vpack.c.bf16 %v1745_v49, %v1744_v48 }
 0x3fe   : > { %2506 = vmatmul.mubr.msk.f32.vlgmr.msra.gmra.mrb[12].mxu1 %vm492_vm6, %v1418_v38  ;;  %v2806_v38 = vpack.c.bf16 %v2273_v37, %v2272_v36 }
 0x3ff   : > { %2769 = vmatpush3.bf16.msra.mxu1 %v2766_v22  ;;  %2526 = vmatprep.mubr.msk.f32.mxu1 %vm492_vm6, %v1388_v27 }
 0x400   : > { %2771 = vmatprep.subr.bf16.mxu1 %v2770_v39  ;;  %2803 = vmatprep.subr.bf16.mxu0 %v2802_v35 }
 0x401   : > { %2805 = vmatpush3.bf16.msra.mxu0 %v2802_v35 }
 0x402   : > { %2807 = vmatprep.subr.bf16.mxu0 %v2806_v38 }
 0x403   : > { %2773 = vmatpush3.bf16.msra.mxu1 %v2770_v39  ;;  %v2274_v39 = vld [vmem:[%s3792_s10 + $0x78] sm:$0xff] }
 0x404   : > { %2775 = vmatprep.subr.bf16.mxu1 %v2774_v5  ;;  %v2810_v41 = vpack.c.bf16 %v2275_v40, %v2274_v39 }
 0x405   : > { %2809 = vmatpush3.bf16.msra.mxu0 %v2806_v38 }
 0x406   : > { %2811 = vmatprep.subr.bf16.mxu0 %v2810_v41 }
 0x407   : > { %2777 = vmatpush3.bf16.msra.mxu1 %v2774_v5 }
 0x408   : > { %2779 = vmatprep.subr.bf16.mxu1 %v2778_v44 }
 0x409   : > { %2813 = vmatpush3.bf16.msra.mxu0 %v2810_v41 }
 0x40b   : > { %2781 = vmatpush3.bf16.msra.mxu1 %v2778_v44  ;;  %v2276_v44 = vld [vmem:[%s3792_s10 + $0x88] sm:$0xff] }
 0x40c   : > { %2524 = vmatprep.subr.mxu1 %v1398_v45  ;;  %2566 = vmatprep.subr.mxu0 %v2276_v44 }
 0x40d   : > { %2567 = vmatpush3.msra.mxu0 %v2276_v44 }
 0x40e   : > { %2815 = vmatprep.subr.bf16.mxu0 %v2814_v51 }
 0x40f   : > { %2525 = vmatpush3.msra.mxu1 %v1398_v45 }
 0x410   : > { %2527 = vmatmul.mubr.msk.f32.vlgmr.msra.gmra.mrb[12].mxu1 %vm492_vm6, %v1389_v31  ;;  %2783 = vmatprep.subr.bf16.mxu1 %v2782_v50 }
 0x411   : > { %2785 = vmatpush3.bf16.msra.mxu1 %v2782_v50  ;;  %2547 = vmatprep.mubr.msk.f32.mxu1 %vm492_vm6, %v1594_v56 }
 0x412   : > { %2787 = vmatprep.subr.bf16.mxu1 %v2786_v53 }
 0x415   : > { %2789 = vmatpush3.bf16.msra.mxu1 %v2786_v53 }
 0x416   : > { %2791 = vmatprep.subr.bf16.mxu1 %v2790_v57 }
 0x419   : > { %2793 = vmatpush3.bf16.msra.mxu1 %v2790_v57 }
 0x41a   : > { %2795 = vmatprep.subr.bf16.mxu1 %v2794_v60 }
 0x41d   : > { %2797 = vmatpush3.bf16.msra.mxu1 %v2794_v60  ;;  %v1747_v60 = vld [vmem:[%s3792_s10 + $0x18] sm:$0xff] }
 0x41e   : > { %2545 = vmatprep.subr.mxu1 %v2264_v61  ;;  %v2818_v0 = vpack.c.bf16 %v1747_v60, %v1746_v59 }
 0x421   : > { %2546 = vmatpush3.msra.mxu1 %v2264_v61 }
 0x422   : > { %2548 = vmatmul.mubr.msk.f32.vlgmr.msra.gmra.mrb[12].mxu1 %vm492_vm6, %v1596_v63 }
 0x4f5   : > { %v2549_v4 = vpop.f32.mrb[12].mxu1 }
 0x4f6   : > { %v1686_v6 = vadd.f32 %v2549_v4, %v2267_v3  ;;  %v1667_v7 = vpop.f32.mrb[13].mxu1 }
 0x4f7   : > { %v1685_v8 = vadd.f32 %v2267_v3, %v1667_v7  ;;  %v1749_v3 = vld [vmem:[%s3792_s10 + $0x28] sm:$0xff]  ;;  %v1750_v7 = vld [vmem:[%s3792_s10 + $0x30] sm:$0xff] }
 0x4f8   : > { %v1690_v9 = vmin.f32 %v1686_v6, 20.0  ;;  %vm1688_vm13 = vcmp.gt.f32.partialorder %v1686_v6, 20.0 }
 0x4f9   : > { %v1689_v10 = vmin.f32 %v1685_v8, 20.0  ;;  %vm1687_vm15 = vcmp.gt.f32.partialorder %v1685_v8, 20.0 }
 0x4fa   : > { %v1693_v11 = vmul.f32 1.442695, %v1690_v9 }
 0x4fb   : > { %v1691_v12 = vmul.f32 1.442695, %v1689_v10  ;;  %v1752_v10 = vld [vmem:[%s3792_s10 + $0x40] sm:$0xff] }
 0x4fc   : > { %2915 = vpow2.f32 %v1693_v11  ;;  %v2281_v11 = vld [vmem:[%s3792_s10 + $0x90] sm:$0xff] }
 0x4fd   : > { %2917 = vpow2.f32 %v1691_v12  ;;  %v2282_v12 = vld [vmem:[%s3792_s10 + $0x98] sm:$0xff] }
 0x506   : > { %v2916_v13 = vpop.eup %2915 }
 0x507   : > { %v2918_v14 = vpop.eup %2917  ;;  %v1704_v16 = vadd.f32 1.0, %v2916_v13  ;;  %v1707_v18 = vmul.f32 -0.5, %v2916_v13  ;;  %v1710_v21 = vand.u32 2147483647, %v2916_v13 }
 0x508   : > { %v1695_v17 = vadd.f32 1.0, %v2918_v14  ;;  %v1698_v19 = vmul.f32 -0.5, %v2918_v14  ;;  %v1701_v23 = vand.u32 2147483647, %v2918_v14 }
 0x509   : > { %2919 = vlog2.f32 %v1704_v16  ;;  %v1708_v20 = vadd.f32 1.0, %v1707_v18  ;;  %vm1711_vm12 = vcmp.lt.f32.partialorder %v1710_v21, 0.0004427343  ;;  %v2284_v16 = vld [vmem:[%s3792_s10 + $0xa8] sm:$0xff]  ;;  %v2285_v21 = vld [vmem:[%s3792_s10 + $0xb0] sm:$0xff] }
 0x50a   : > { %2921 = vlog2.f32 %v1695_v17  ;;  %v1699_v22 = vadd.f32 1.0, %v1698_v19  ;;  %vm1702_vm14 = vcmp.lt.f32.partialorder %v1701_v23, 0.0004427343  ;;  %v2830_v17 = vpack.c.bf16 %v2282_v12, %v2281_v11 }
 0x50b   : > { %v1709_v26 = vmul.f32 %v2916_v13, %v1708_v20 }
 0x50c   : > { %v1700_v28 = vmul.f32 %v2918_v14, %v1699_v22  ;;  %v2283_v14 = vld [vmem:[%s3792_s10 + $0xa0] sm:$0xff]  ;;  %v2286_v22 = vld [vmem:[%s3792_s10 + $0xb8] sm:$0xff] }
 0x50d   : > { %v2834_v20 = vpack.c.bf16 %v2284_v16, %v2283_v14 }
 0x513   : > { %v2920_v15 = vpop.eup %2919 }
 0x514   : > { %v2922_v24 = vpop.eup %2921  ;;  %v1706_v25 = vmul.f32 0.6931472, %v2920_v15  ;;  %v2838_v15 = vpack.c.bf16 %v2286_v22, %v2285_v21 }
 0x515   : > { %v1697_v27 = vmul.f32 0.6931472, %v2922_v24  ;;  %v2287_v24 = vld [vmem:[%s3792_s10 + $0xc0] sm:$0xff] }
 0x516   : > { %v1712_v29 = vsel %vm1711_vm12, %v1709_v26, %v1706_v25  ;;  %v2288_v25 = vld [vmem:[%s3792_s10 + $0xc8] sm:$0xff] }
 0x517   : > { %v1714_v30 = vsel %vm1688_vm13, %v1686_v6, %v1712_v29  ;;  %v1703_v31 = vsel %vm1702_vm14, %v1700_v28, %v1697_v27  ;;  %v2842_v26 = vpack.c.bf16 %v2288_v25, %v2287_v24  ;;  %v2289_v28 = vld [vmem:[%s3792_s10 + $0xd0] sm:$0xff] }
 0x518   : > { %2923 = vtanh.f32 %v1714_v30  ;;  %v1713_v32 = vsel %vm1687_vm15, %v1685_v8, %v1703_v31  ;;  %v2292_v31 = vld [vmem:[%s3793_s11] ss:$0 sm:$0xff] }
 0x519   : > { %2925 = vtanh.f32 %v1713_v32 }
 0x522   : > { %v2924_v5 = vpop.eup %2923 }
 0x523   : > { %v2926_v42 = vpop.eup %2925  ;;  %v1718_v43 = vmul.f32 %v2924_v5, %v1686_v6  ;;  %v2822_v6 = vpack.c.bf16 %v1749_v3, %v1748_v2 }
 0x524   : > { %v1717_v45 = vmul.f32 %v2926_v42, %v1685_v8  ;;  %v1751_v8 = vld [vmem:[%s3792_s10 + $0x38] sm:$0xff] }
 0x525   : > { %v1728_v46 = vrot.slane %v1718_v43, 7  ;;  %v2826_v9 = vpack.c.bf16 %v1751_v8, %v1750_v7 }
 0x526   : > { %v1727_v47 = vrot.slane %v1717_v45, 7 }
 0x528   : > { %1730 = vrot.lane.b32.xlu0 %v1727_v47, %s3004_s27  ;;  %v1729_v50 = vsel %vm441_vm1, %v1727_v47, %v1728_v46 }
 0x529   : > { %1732 = vrot.lane.b32.xlu1 %v1729_v50, %s3004_s27 }
 0x52c   : > { %1734 = vrot.lane.b32.xlu0 %v1728_v46, %s3004_s27  ;;  %s2943_s27 = sshll.u32 %s3007_s26, 4  ;;  %s2944_s27 = int_to_ptr.vmem [resolvable:$false] %s2943_s27 }
 0x52d   : > { %s2945_s28 = scalar_lea.vmem %s2944_s27, 512  ;;  %p2946_p0 = scmp.lt.s32.totalorder %s3739_s14, %s2944_s27 }
 0x52e   : > { %p2947_p1 = scmp.lt.s32.totalorder %s2945_s28, %s2939_s25 }
 0x530   : > { %p2948_p2 = por %p2947_p1, %p2946_p0 }
 0x532   : > { %p2949_p3 = pnand %p2948_p2, %p2942_p13 }
 0x59a   : > { %v1731_v52 = vpop.permute.xlu0 %1730 }
 0x59b   : > { %1739 = vst.msk [vmem:[#allocation2] sm:$0xfe] %vm454_vm2, %v1731_v52  ;;  %v1733_v53 = vpop.permute.xlu1 %1732 }
 0x59c   : > { %1740 = vst.msk [vmem:[#allocation2 + $0x10] sm:$0xff] %vm456_vm4, %v1733_v53 }
 0x59e   : > { %v1735_v54 = vpop.permute.xlu0 %1734 }
 0x59f   : > { %1741 = vst.msk [vmem:[#allocation2 + $0x20] sm:$0x1] %vm458_vm3, %v1735_v54 }
 0x5a2   : > { %v1753_v55 = vld [vmem:[#allocation2] sm:$0xfe] }
 0x5a3   : > { %v3666_v56 = vld [vmem:[#allocation2 + $0x10] sm:$0xff]  ;;  %v1768_v57 = vrot.slane %v1753_v55, 1  ;;  %v1742_v4 = vld [vmem:[#allocation2] sm:$0xff] }
 0x5a4   : > { %v1769_v58 = vrot.slane %v3666_v56, 1  ;;  %v1932_v13 = vld [vmem:[#allocation2] sm:$0xfc]  ;;  %v1947_v19 = vrot.slane %v3666_v56, 2 }
 0x5a5   : > { %v1946_v18 = vrot.slane %v1932_v13, 2 }
 0x5a6   : > { %v1770_v61 = vsel %vm486_vm5, %v1768_v57, %v1769_v58  ;;  %v1754_v62 = vld [vmem:[#allocation2 + $0x20] sm:$0x1] }
 0x5a7   : > { %2568 = vmatprep.mubr.msk.f32.mxu0 %vm492_vm6, %v1770_v61  ;;  %v1771_v63 = vrot.slane %v1754_v62, 1  ;;  %v1948_v23 = vsel %vm666_vm7, %v1946_v18, %v1947_v19  ;;  %v1933_v27 = vld [vmem:[#allocation2 + $0x20] sm:$0x3] }
 0x5a8   : > { %v1949_v29 = vrot.slane %v1933_v27, 2 }
 0x5a9   : > { %v1772_v1 = vsel %vm486_vm5, %v1769_v58, %v1771_v63 }
 0x5aa   : > { %2569 = vmatmul.mubr.msk.f32.vlgmr.msra.gmra.mrb[6].mxu0 %vm492_vm6, %v1772_v1  ;;  %v1950_v30 = vsel %vm666_vm7, %v1947_v19, %v1949_v29 }
 0x5ab   : > { %2817 = vmatpush3.bf16.msra.mxu0 %v2814_v51  ;;  %2589 = vmatprep.mubr.msk.f32.mxu0 %vm492_vm6, %v1742_v4 }
 0x5ac   : > { %2819 = vmatprep.subr.bf16.mxu0 %v2818_v0 }
 0x5af   : > { %2821 = vmatpush3.bf16.msra.mxu0 %v2818_v0 }
 0x5b0   : > { %2823 = vmatprep.subr.bf16.mxu0 %v2822_v6 }
 0x5b3   : > { %2825 = vmatpush3.bf16.msra.mxu0 %v2822_v6 }
 0x5b4   : > { %2827 = vmatprep.subr.bf16.mxu0 %v2826_v9 }
 0x5b7   : > { %2829 = vmatpush3.bf16.msra.mxu0 %v2826_v9 }
 0x5b8   : > { %2587 = vmatprep.subr.mxu0 %v1752_v10 }
 0x5bb   : > { %2588 = vmatpush3.msra.mxu0 %v1752_v10 }
 0x5bc   : > { %2590 = vmatmul.mubr.msk.f32.vlgmr.msra.gmra.mrb[6].mxu0 %vm492_vm6, %v3666_v56  ;;  %2831 = vmatprep.subr.bf16.mxu0 %v2830_v17 }
 0x5bd   : > { %2833 = vmatpush3.bf16.msra.mxu0 %v2830_v17  ;;  %2610 = vmatprep.mubr.msk.f32.mxu0 %vm492_vm6, %v1948_v23 }
 0x5be   : > { %2835 = vmatprep.subr.bf16.mxu0 %v2834_v20 }
 0x5c1   : > { %2837 = vmatpush3.bf16.msra.mxu0 %v2834_v20 }
 0x5c2   : > { %2839 = vmatprep.subr.bf16.mxu0 %v2838_v15 }
 0x5c5   : > { %2841 = vmatpush3.bf16.msra.mxu0 %v2838_v15 }
 0x5c6   : > { %2843 = vmatprep.subr.bf16.mxu0 %v2842_v26 }
 0x5c9   : > { %2845 = vmatpush3.bf16.msra.mxu0 %v2842_v26 }
 0x5ca   : > { %2608 = vmatprep.subr.mxu0 %v2289_v28 }
 0x5cd   : > { %2609 = vmatpush3.msra.mxu0 %v2289_v28 }
 0x5ce   : > { %2611 = vmatmul.mubr.msk.f32.vlgmr.msra.gmra.mrb[6].mxu0 %vm492_vm6, %v1950_v30 }
 0x6a1   : > { %v2612_v32 = vpop.f32.mrb[6].mxu0 }
 0x6a2   : > { %v2040_v33 = vadd.f32 %v2612_v32, %v2292_v31  ;;  %v2021_v34 = vpop.f32.mrb[7].mxu0 }
 0x6a3   : > { %v2039_v35 = vadd.f32 %v2292_v31, %v2021_v34 }
 0x6a4   : > { %v2044_v36 = vmin.f32 %v2040_v33, 20.0  ;;  %vm2042_vm2 = vcmp.gt.f32.partialorder %v2040_v33, 20.0 }
 0x6a5   : > { %v2043_v37 = vmin.f32 %v2039_v35, 20.0  ;;  %vm2041_vm4 = vcmp.gt.f32.partialorder %v2039_v35, 20.0 }
 0x6a6   : > { %v2047_v38 = vmul.f32 1.442695, %v2044_v36 }
 0x6a7   : > { %v2045_v39 = vmul.f32 1.442695, %v2043_v37 }
 0x6a8   : > { %2927 = vpow2.f32 %v2047_v38 }
 0x6a9   : > { %2929 = vpow2.f32 %v2045_v39 }
 0x6b2   : > { %v2928_v40 = vpop.eup %2927 }
 0x6b3   : > { %v2930_v41 = vpop.eup %2929  ;;  %v2058_v5 = vadd.f32 1.0, %v2928_v40  ;;  %v2061_v43 = vmul.f32 -0.5, %v2928_v40  ;;  %v2064_v46 = vand.u32 2147483647, %v2928_v40 }
 0x6b4   : > { %v2049_v42 = vadd.f32 1.0, %v2930_v41  ;;  %v2052_v44 = vmul.f32 -0.5, %v2930_v41  ;;  %v2055_v48 = vand.u32 2147483647, %v2930_v41 }
 0x6b5   : > { %2931 = vlog2.f32 %v2058_v5  ;;  %v2062_v45 = vadd.f32 1.0, %v2061_v43  ;;  %vm2065_vm1 = vcmp.lt.f32.partialorder %v2064_v46, 0.0004427343 }
 0x6b6   : > { %2933 = vlog2.f32 %v2049_v42  ;;  %v2053_v47 = vadd.f32 1.0, %v2052_v44  ;;  %vm2056_vm3 = vcmp.lt.f32.partialorder %v2055_v48, 0.0004427343 }
 0x6b7   : > { %v2063_v52 = vmul.f32 %v2928_v40, %v2062_v45 }
 0x6b8   : > { %v2054_v54 = vmul.f32 %v2930_v41, %v2053_v47 }
 0x6bf   : > { %v2932_v49 = vpop.eup %2931 }
 0x6c0   : > { %v2934_v50 = vpop.eup %2933  ;;  %v2060_v51 = vmul.f32 0.6931472, %v2932_v49 }
 0x6c1   : > { %v2051_v53 = vmul.f32 0.6931472, %v2934_v50 }
 0x6c2   : > { %v2066_v55 = vsel %vm2065_vm1, %v2063_v52, %v2060_v51 }
 0x6c3   : > { %v2068_v56 = vsel %vm2042_vm2, %v2040_v33, %v2066_v55  ;;  %v2057_v57 = vsel %vm2056_vm3, %v2054_v54, %v2051_v53 }
 0x6c4   : > { %2935 = vtanh.f32 %v2068_v56  ;;  %v2067_v58 = vsel %vm2041_vm4, %v2039_v35, %v2057_v57 }
 0x6c5   : > { %2937 = vtanh.f32 %v2067_v58 }
 0x6ce   : > { %v2936_v59 = vpop.eup %2935 }
 0x6cf   : > { %v2938_v60 = vpop.eup %2937  ;;  %v2072_v61 = vmul.f32 %v2936_v59, %v2040_v33 }
 0x6d0   : > { %v2071_v62 = vmul.f32 %v2938_v60, %v2039_v35 }
 0x6d1   : > { %2074 = vst [vmem:[%s419_s21 + $0x8] sm:$0xff] %v2072_v61 }
 0x6d2   : > { %2073 = vst [vmem:[%s419_s21] sm:$0xff] %v2071_v62 }
 0x6d3   : > { %2952 = shalt.err (!%p2949_p3)
}
 0x6d4   : > { %s2953_s15 = scalar_lea.hbm %s3737_s19, 256  ;;  %s2957_s23 = scalar_lea.hbm %s3794_s12, 512 }
 0x6d5   : > { %p2954_p4 = scmp.ne.s32.totalorder %s3737_s19, %s2953_s15  ;;  %p2958_p9 = scmp.lt.u32.totalorder %s3737_s19, %s3794_s12 }
 0x6d6   : > { %p2959_p10 = scmp.lt.u32.totalorder %s2957_s23, %s2953_s15  ;;  %p2961_p12 = scmp.lt.u32.totalorder %s2953_s15, %s3737_s19 }
 0x6d7   : > { %p2955_p7 = pnand %p2954_p4, %p3113_p5 }
 0x6d8   : > { %p2960_p11 = por %p2959_p10, %p2958_p9 }
 0x6d9   : > { %p2956_p8 = pneg %p2955_p7 }
 0x6da   : > { %p2962_p13 = por %p2961_p12, %p2960_p11 }
 0x6dc   : > { %p2963_p0 = pnand %p2962_p13, %p2956_p8 }
 0x6de   : > { %2966 = shalt.err (!%p2963_p0)
}
 0x6df   : > { %s3008_s17 = smov 128   ;;  %s3009_s18 = smov 8  }
 0x6e0   : > { %2858 = dma.vmem_to_hbm [thread:$0]  (%p3113_p5), %s3739_s14, 256, %s3737_s19, %s3741_s20, %s3008_s17, %s3008_s17, %s3009_s18  }
 0x6e1 PF: > { %s3807_s25 = sld [smem:[#allocation6_spill]]  ;;  %p2864_p1 = scmp.ge.s32.totalorder %s3001_s24, 2 }
 0x6e3   : > { %p2861_p2 = pnand %p2864_p1, %p3117_p6 }
 0x6e7   : > { %s2104_s27 = sand.u32 1, %s3807_s25  }
 0x6e8   : > { %s2105_s28 = scalar_lea.sflag [#allocation4], %s2104_s27 }
 0x6e9   : > { %2984 = dma.done.wait (!%p2861_p2), %s2105_s28, 256  }
 0x6ea   : > { %2986 = vsyncadd (!%p2861_p2), %s2105_s28, 4294967040  ;;  %s3809_s24 = sld [smem:[#allocation8_spill]]  ;;  %s3810_s15 = sld [smem:[#allocation7_spill]] }
 0x6eb   : > { %s3811_s23 = sld [smem:[#allocation9_spill]]  ;;  %s3812_s21 = smov %s2993_s22 }
 0x6f0   : > { %p22_p3 = scmp.ge.s32.totalorder %s3809_s24, 4   ;;  %s3813_s22 = smov %s3810_s15 }
 0x6f2   :  { %24 = sbr.rel (!%p22_p3) target bundleno = 3 (0x3), region = 114 }
 0x6f9   :  { %2110 = vsyncpa [#allocation4], 1 }
 0x6fa   :  { %2112 = vsyncpa [#allocation4 + $0x1], 1 }

</bundles_post_ra>
